<compile_context>
chip_gen: v7x
topology: tpu7x:2x2x1
jax: 0.10.0
libtpu: 0.0.40
codegen_flags: <defaults>
</compile_context>

<pallas_src>
import functools

import jax
import jax.numpy as jnp
from jax.experimental import pallas as pl
from jax.experimental.pallas import tpu as pltpu

jax.config.update("jax_default_matmul_precision", "highest")

_LANES = 128  # f32 lane width; output is stored lane-dense at this width.


def critic_kernel(sa_ref, h0_ref, c0_ref,
                  wih_ref, whh_ref, b_ref,
                  w2_ref, b2_ref, w3_ref, b3_ref,
                  out_ref, *, seq_len, batch, hidden_dim):
    T, B, H = seq_len, batch, hidden_dim          # B here is the padded batch
    f32 = jnp.float32
    hi = jax.lax.Precision.HIGHEST

    # ---- Phase 1 (off the serial path): input projection for ALL timesteps.
    # (T*Bp, D) x (D, 4H) on the MXU, combined bias (b_ih + b_hh) folded in.
    x_proj = (jnp.dot(sa_ref[...], wih_ref[...],
                      preferred_element_type=f32, precision=hi)
              + b_ref[...])                                     # (T*Bp, 4H)

    whh = whh_ref[...]                                          # (H, 4H)
    h = h0_ref[...].astype(f32)                                 # (Bp, H)
    c = c0_ref[...].astype(f32)                                 # (Bp, H)

    # ---- Phase 2: serial LSTM recurrence, fully unrolled (T small & static).
    # Only the tiny h @ W_hh^T matmul + gate math is on the critical path.
    # Bp = 8 => every x_proj row-slice is one aligned (8, 128) vreg tile.
    hs = []
    for t in range(T):
        gates = x_proj[t * B:(t + 1) * B, :] + jnp.dot(
            h, whh, preferred_element_type=f32, precision=hi)   # (Bp, 4H)
        # One sigmoid + one tanh over the full 128-lane gates vreg, then take
        # 32-lane windows.  PyTorch gate order: i, f, g, o.
        sg = jax.nn.sigmoid(gates)
        tg = jnp.tanh(gates)
        i_g = sg[:, 0 * H:1 * H]
        f_g = sg[:, 1 * H:2 * H]
        g_g = tg[:, 2 * H:3 * H]
        o_g = sg[:, 3 * H:4 * H]
        c = f_g * c + i_g * g_g
        h = o_g * jnp.tanh(c)
        hs.append(h)                                            # stays in vregs

    # ---- Phase 3 (off the serial path): MLP head on all timesteps at once.
    h_all = jnp.concatenate(hs, axis=0)                         # (T*Bp, H)
    q1 = jnp.maximum(
        jnp.dot(h_all, w2_ref[...], preferred_element_type=f32, precision=hi)
        + b2_ref[...], 0.0)                                     # (T*Bp, H)
    # l3: (H -> 1) projection as VPU multiply + lane reduction (no N=1 matmul).
    q = jnp.sum(q1 * w3_ref[...], axis=-1, keepdims=True) + b3_ref[0]
    # Lane-dense, unmasked store: broadcast q across the 128-lane tile; the
    # wrapper reads back lane 0.  Avoids vst.msk / 1-lane strided writeback.
    out_ref[...] = jnp.broadcast_to(q, (T * B, _LANES)).astype(out_ref.dtype)


def prepack_params(params):
    """One-time weight repack (kept OUTSIDE the per-call path)."""
    H = params["w_hh"].shape[1]
    return {
        "wih_t": params["w_ih"].T,                              # (D, 4H)
        "whh_t": params["w_hh"].T,                              # (H, 4H)
        "b": (params["b_ih"] + params["b_hh"]).reshape(1, 4 * H),
        "w2_t": params["w2"].T,                                 # (H, H)
        "b2": params["b2"].reshape(1, H),
        "w3_row": params["w3"].reshape(1, H),                   # (1, H)
        "b3": params["b3"].reshape(1),                          # scalar -> SMEM
    }


@jax.jit
def critic_forward(state, action, hidden, packed):
    """Pallas implementation of Critic.forward (recurrent=True)."""
    sa = jnp.concatenate([state, action], axis=-1)              # (B, T, D)
    B, T, D = sa.shape
    H = packed["whh_t"].shape[0]
    Bp = ((B + 7) // 8) * 8            # pad batch to one f32 sublane tile

    # Zero-pad batch, go time-major, flatten: row index = t*Bp + b.
    # (These reshapes fuse into the same jit program as the kernel call.)
    sa_p = jnp.pad(sa, ((0, Bp - B), (0, 0), (0, 0)))
    sa_tm = jnp.transpose(sa_p, (1, 0, 2)).reshape(T * Bp, D)
    h0 = jnp.pad(hidden[0][0], ((0, Bp - B), (0, 0)))           # (Bp, H)
    c0 = jnp.pad(hidden[1][0], ((0, Bp - B), (0, 0)))           # (Bp, H)

    kernel = functools.partial(critic_kernel,
                               seq_len=T, batch=Bp, hidden_dim=H)

    vmem = pl.BlockSpec(memory_space=pltpu.MemorySpace.VMEM)
    smem = pl.BlockSpec(memory_space=pltpu.MemorySpace.SMEM)

    out_wide = pl.pallas_call(
        kernel,
        out_shape=jax.ShapeDtypeStruct((T * Bp, _LANES), jnp.float32),
        in_specs=[vmem,   # sa        (T*Bp, D)
                  vmem,   # h0        (Bp, H)
                  vmem,   # c0        (Bp, H)
                  vmem,   # W_ih^T    (D, 4H)
                  vmem,   # W_hh^T    (H, 4H)
                  vmem,   # b_ih+b_hh (1, 4H)
                  vmem,   # W2^T      (H, H)
                  vmem,   # b2        (1, H)
                  vmem,   # w3 row    (1, H)
                  smem],  # b3        (1,)
        out_specs=vmem,
    )(sa_tm, h0, c0, packed["wih_t"], packed["whh_t"], packed["b"],
      packed["w2_t"], packed["b2"], packed["w3_row"], packed["b3"])

    # Lane 0 holds q; drop pad rows, back to batch-major (B, T, 1).
    q = out_wide[:, 0].reshape(T, Bp)[:, :B]                    # (T, B)
    return jnp.transpose(q, (1, 0))[:, :, None]                 # (B, T, 1)


def critic_ref(state, action, hidden, params):
    """Pure-JAX reference matching PyTorch semantics."""
    sa = jnp.concatenate([state, action], axis=-1)
    h0, c0 = hidden

    def step(carry, x_t):
        h, c = carry
        gates = (x_t @ params["w_ih"].T + params["b_ih"]
                 + h @ params["w_hh"].T + params["b_hh"])
        i, f, g, o = jnp.split(gates, 4, axis=-1)
        i, f, o = jax.nn.sigmoid(i), jax.nn.sigmoid(f), jax.nn.sigmoid(o)
        g = jnp.tanh(g)
        c = f * c + i * g
        h = o * jnp.tanh(c)
        return (h, c), h

    sa_tm = jnp.transpose(sa, (1, 0, 2))
    _, hs = jax.lax.scan(step, (h0[0], c0[0]), sa_tm)           # (T, B, H)
    q1 = jnp.maximum(hs @ params["w2"].T + params["b2"], 0.0)
    q = q1 @ params["w3"].T + params["b3"]
    return jnp.transpose(q, (1, 0, 2))


def init_params(key, state_dim, action_dim, hidden_dim):
    d_in = state_dim + action_dim
    ks = jax.random.split(key, 8)
    bound = 1.0 / jnp.sqrt(hidden_dim)
    u = lambda k, shape, b: jax.random.uniform(k, shape, jnp.float32, -b, b)
    return {
        "w_ih": u(ks[0], (4 * hidden_dim, d_in), bound),
        "w_hh": u(ks[1], (4 * hidden_dim, hidden_dim), bound),
        "b_ih": u(ks[2], (4 * hidden_dim,), bound),
        "b_hh": u(ks[3], (4 * hidden_dim,), bound),
        "w2":   u(ks[4], (hidden_dim, hidden_dim), bound),
        "b2":   u(ks[5], (hidden_dim,), bound),
        "w3":   u(ks[6], (1, hidden_dim), bound),
        "b3":   u(ks[7], (1,), bound),
    }


if __name__ == "__main__":
    B, T = 2, 8
    state_dim, action_dim, hidden_dim = 12, 4, 32

    key = jax.random.PRNGKey(0)
    k_p, k_s, k_a, k_h, k_c = jax.random.split(key, 5)
    params = init_params(k_p, state_dim, action_dim, hidden_dim)
    packed = prepack_params(params)          # one-time repack, off the hot path

    state = jax.random.normal(k_s, (B, T, state_dim), jnp.float32)
    action = jax.random.normal(k_a, (B, T, action_dim), jnp.float32)
    h0 = jax.random.normal(k_h, (1, B, hidden_dim), jnp.float32) * 0.1
    c0 = jax.random.normal(k_c, (1, B, hidden_dim), jnp.float32) * 0.1
    hidden = (h0, c0)

    out = critic_forward(state, action, hidden, packed)
    out = jax.block_until_ready(out)

    ref = critic_ref(state, action, hidden, params)
    assert out.shape == (B, T, 1)
    assert jnp.allclose(out, ref, atol=1e-5, rtol=1e-5), (
        f"max err {jnp.max(jnp.abs(out - ref))}")
    print("KERNEL_OK")
</pallas_src>

<mosaic_0001>
module attributes {stable_mosaic.version = 11 : i64} {
  func.func @critic_kernel(%arg0: memref<64x16xf32, #tpu.memory_space<vmem>>, %arg1: memref<8x32xf32, #tpu.memory_space<vmem>>, %arg2: memref<8x32xf32, #tpu.memory_space<vmem>>, %arg3: memref<16x128xf32, #tpu.memory_space<vmem>>, %arg4: memref<32x128xf32, #tpu.memory_space<vmem>>, %arg5: memref<1x128xf32, #tpu.memory_space<vmem>>, %arg6: memref<32x32xf32, #tpu.memory_space<vmem>>, %arg7: memref<1x32xf32, #tpu.memory_space<vmem>>, %arg8: memref<1x32xf32, #tpu.memory_space<vmem>>, %arg9: memref<1xf32, #tpu.memory_space<smem>>, %arg10: memref<64x128xf32, #tpu.memory_space<vmem>>) attributes {dimension_semantics = [], scalar_prefetch = 0 : i64, scratch_operands = 0 : i64, tpu.core_type = #tpu.core_type<tc>} {
    %c0 = arith.constant 0 : index
    %c0_0 = arith.constant 0 : index
    %0 = vector.load %arg0[%c0, %c0_0] : memref<64x16xf32, #tpu.memory_space<vmem>>, vector<64x16xf32>
    %c0_1 = arith.constant 0 : index
    %c0_2 = arith.constant 0 : index
    %1 = vector.load %arg3[%c0_1, %c0_2] : memref<16x128xf32, #tpu.memory_space<vmem>>, vector<16x128xf32>
    %cst = arith.constant dense<0.000000e+00> : vector<64x128xf32>
    %2 = tpu.matmul %0, %1, %cst {dimension_numbers = #tpu.dot_dimension_numbers<[1], [0], [0], [1], [0, 0, 1, 1], [], []>, precision = #tpu.contract_precision<fp32>} : vector<64x16xf32>, vector<16x128xf32>, vector<64x128xf32> -> vector<64x128xf32>
    %c0_3 = arith.constant 0 : index
    %c0_4 = arith.constant 0 : index
    %3 = vector.load %arg5[%c0_3, %c0_4] : memref<1x128xf32, #tpu.memory_space<vmem>>, vector<1x128xf32>
    %4 = vector.broadcast %3 : vector<1x128xf32> to vector<64x128xf32>
    %5 = arith.addf %2, %4 : vector<64x128xf32>
    %c0_5 = arith.constant 0 : index
    %c0_6 = arith.constant 0 : index
    %6 = vector.load %arg4[%c0_5, %c0_6] : memref<32x128xf32, #tpu.memory_space<vmem>>, vector<32x128xf32>
    %c0_7 = arith.constant 0 : index
    %c0_8 = arith.constant 0 : index
    %7 = vector.load %arg1[%c0_7, %c0_8] : memref<8x32xf32, #tpu.memory_space<vmem>>, vector<8x32xf32>
    %c0_9 = arith.constant 0 : index
    %c0_10 = arith.constant 0 : index
    %8 = vector.load %arg2[%c0_9, %c0_10] : memref<8x32xf32, #tpu.memory_space<vmem>>, vector<8x32xf32>
    %9 = vector.extract_strided_slice %5 {offsets = [0, 0], sizes = [8, 128], strides = [1, 1]} : vector<64x128xf32> to vector<8x128xf32>
    %cst_11 = arith.constant dense<0.000000e+00> : vector<8x128xf32>
    %10 = tpu.matmul %7, %6, %cst_11 {dimension_numbers = #tpu.dot_dimension_numbers<[1], [0], [0], [1], [0, 0, 1, 1], [], []>, precision = #tpu.contract_precision<fp32>} : vector<8x32xf32>, vector<32x128xf32>, vector<8x128xf32> -> vector<8x128xf32>
    %11 = arith.addf %9, %10 : vector<8x128xf32>
    %12 = arith.negf %11 : vector<8x128xf32>
    %13 = math.exp %12 : vector<8x128xf32>
    %cst_12 = arith.constant 1.000000e+00 : f32
    %14 = vector.broadcast %cst_12 : f32 to vector<8x128xf32>
    %15 = arith.addf %14, %13 : vector<8x128xf32>
    %16 = arith.divf %14, %15 : vector<8x128xf32>
    %17 = math.tanh %11 : vector<8x128xf32>
    %18 = vector.extract_strided_slice %16 {offsets = [0, 0], sizes = [8, 32], strides = [1, 1]} : vector<8x128xf32> to vector<8x32xf32>
    %19 = vector.extract_strided_slice %16 {offsets = [0, 32], sizes = [8, 32], strides = [1, 1]} : vector<8x128xf32> to vector<8x32xf32>
    %20 = vector.extract_strided_slice %17 {offsets = [0, 64], sizes = [8, 32], strides = [1, 1]} : vector<8x128xf32> to vector<8x32xf32>
    %21 = vector.extract_strided_slice %16 {offsets = [0, 96], sizes = [8, 32], strides = [1, 1]} : vector<8x128xf32> to vector<8x32xf32>
    %22 = arith.mulf %19, %8 : vector<8x32xf32>
    %23 = arith.mulf %18, %20 : vector<8x32xf32>
    %24 = arith.addf %22, %23 : vector<8x32xf32>
    %25 = math.tanh %24 : vector<8x32xf32>
    %26 = arith.mulf %21, %25 : vector<8x32xf32>
    %27 = vector.extract_strided_slice %5 {offsets = [8, 0], sizes = [8, 128], strides = [1, 1]} : vector<64x128xf32> to vector<8x128xf32>
    %cst_13 = arith.constant dense<0.000000e+00> : vector<8x128xf32>
    %28 = tpu.matmul %26, %6, %cst_13 {dimension_numbers = #tpu.dot_dimension_numbers<[1], [0], [0], [1], [0, 0, 1, 1], [], []>, precision = #tpu.contract_precision<fp32>} : vector<8x32xf32>, vector<32x128xf32>, vector<8x128xf32> -> vector<8x128xf32>
    %29 = arith.addf %27, %28 : vector<8x128xf32>
    %30 = arith.negf %29 : vector<8x128xf32>
    %31 = math.exp %30 : vector<8x128xf32>
    %cst_14 = arith.constant 1.000000e+00 : f32
    %32 = vector.broadcast %cst_14 : f32 to vector<8x128xf32>
    %33 = arith.addf %32, %31 : vector<8x128xf32>
    %34 = arith.divf %32, %33 : vector<8x128xf32>
    %35 = math.tanh %29 : vector<8x128xf32>
    %36 = vector.extract_strided_slice %34 {offsets = [0, 0], sizes = [8, 32], strides = [1, 1]} : vector<8x128xf32> to vector<8x32xf32>
    %37 = vector.extract_strided_slice %34 {offsets = [0, 32], sizes = [8, 32], strides = [1, 1]} : vector<8x128xf32> to vector<8x32xf32>
    %38 = vector.extract_strided_slice %35 {offsets = [0, 64], sizes = [8, 32], strides = [1, 1]} : vector<8x128xf32> to vector<8x32xf32>
    %39 = vector.extract_strided_slice %34 {offsets = [0, 96], sizes = [8, 32], strides = [1, 1]} : vector<8x128xf32> to vector<8x32xf32>
    %40 = arith.mulf %37, %24 : vector<8x32xf32>
    %41 = arith.mulf %36, %38 : vector<8x32xf32>
    %42 = arith.addf %40, %41 : vector<8x32xf32>
    %43 = math.tanh %42 : vector<8x32xf32>
    %44 = arith.mulf %39, %43 : vector<8x32xf32>
    %45 = vector.extract_strided_slice %5 {offsets = [16, 0], sizes = [8, 128], strides = [1, 1]} : vector<64x128xf32> to vector<8x128xf32>
    %cst_15 = arith.constant dense<0.000000e+00> : vector<8x128xf32>
    %46 = tpu.matmul %44, %6, %cst_15 {dimension_numbers = #tpu.dot_dimension_numbers<[1], [0], [0], [1], [0, 0, 1, 1], [], []>, precision = #tpu.contract_precision<fp32>} : vector<8x32xf32>, vector<32x128xf32>, vector<8x128xf32> -> vector<8x128xf32>
    %47 = arith.addf %45, %46 : vector<8x128xf32>
    %48 = arith.negf %47 : vector<8x128xf32>
    %49 = math.exp %48 : vector<8x128xf32>
    %cst_16 = arith.constant 1.000000e+00 : f32
    %50 = vector.broadcast %cst_16 : f32 to vector<8x128xf32>
    %51 = arith.addf %50, %49 : vector<8x128xf32>
    %52 = arith.divf %50, %51 : vector<8x128xf32>
    %53 = math.tanh %47 : vector<8x128xf32>
    %54 = vector.extract_strided_slice %52 {offsets = [0, 0], sizes = [8, 32], strides = [1, 1]} : vector<8x128xf32> to vector<8x32xf32>
    %55 = vector.extract_strided_slice %52 {offsets = [0, 32], sizes = [8, 32], strides = [1, 1]} : vector<8x128xf32> to vector<8x32xf32>
    %56 = vector.extract_strided_slice %53 {offsets = [0, 64], sizes = [8, 32], strides = [1, 1]} : vector<8x128xf32> to vector<8x32xf32>
    %57 = vector.extract_strided_slice %52 {offsets = [0, 96], sizes = [8, 32], strides = [1, 1]} : vector<8x128xf32> to vector<8x32xf32>
    %58 = arith.mulf %55, %42 : vector<8x32xf32>
    %59 = arith.mulf %54, %56 : vector<8x32xf32>
    %60 = arith.addf %58, %59 : vector<8x32xf32>
    %61 = math.tanh %60 : vector<8x32xf32>
    %62 = arith.mulf %57, %61 : vector<8x32xf32>
    %63 = vector.extract_strided_slice %5 {offsets = [24, 0], sizes = [8, 128], strides = [1, 1]} : vector<64x128xf32> to vector<8x128xf32>
    %cst_17 = arith.constant dense<0.000000e+00> : vector<8x128xf32>
    %64 = tpu.matmul %62, %6, %cst_17 {dimension_numbers = #tpu.dot_dimension_numbers<[1], [0], [0], [1], [0, 0, 1, 1], [], []>, precision = #tpu.contract_precision<fp32>} : vector<8x32xf32>, vector<32x128xf32>, vector<8x128xf32> -> vector<8x128xf32>
    %65 = arith.addf %63, %64 : vector<8x128xf32>
    %66 = arith.negf %65 : vector<8x128xf32>
    %67 = math.exp %66 : vector<8x128xf32>
    %cst_18 = arith.constant 1.000000e+00 : f32
    %68 = vector.broadcast %cst_18 : f32 to vector<8x128xf32>
    %69 = arith.addf %68, %67 : vector<8x128xf32>
    %70 = arith.divf %68, %69 : vector<8x128xf32>
    %71 = math.tanh %65 : vector<8x128xf32>
    %72 = vector.extract_strided_slice %70 {offsets = [0, 0], sizes = [8, 32], strides = [1, 1]} : vector<8x128xf32> to vector<8x32xf32>
    %73 = vector.extract_strided_slice %70 {offsets = [0, 32], sizes = [8, 32], strides = [1, 1]} : vector<8x128xf32> to vector<8x32xf32>
    %74 = vector.extract_strided_slice %71 {offsets = [0, 64], sizes = [8, 32], strides = [1, 1]} : vector<8x128xf32> to vector<8x32xf32>
    %75 = vector.extract_strided_slice %70 {offsets = [0, 96], sizes = [8, 32], strides = [1, 1]} : vector<8x128xf32> to vector<8x32xf32>
    %76 = arith.mulf %73, %60 : vector<8x32xf32>
    %77 = arith.mulf %72, %74 : vector<8x32xf32>
    %78 = arith.addf %76, %77 : vector<8x32xf32>
    %79 = math.tanh %78 : vector<8x32xf32>
    %80 = arith.mulf %75, %79 : vector<8x32xf32>
    %81 = vector.extract_strided_slice %5 {offsets = [32, 0], sizes = [8, 128], strides = [1, 1]} : vector<64x128xf32> to vector<8x128xf32>
    %cst_19 = arith.constant dense<0.000000e+00> : vector<8x128xf32>
    %82 = tpu.matmul %80, %6, %cst_19 {dimension_numbers = #tpu.dot_dimension_numbers<[1], [0], [0], [1], [0, 0, 1, 1], [], []>, precision = #tpu.contract_precision<fp32>} : vector<8x32xf32>, vector<32x128xf32>, vector<8x128xf32> -> vector<8x128xf32>
    %83 = arith.addf %81, %82 : vector<8x128xf32>
    %84 = arith.negf %83 : vector<8x128xf32>
    %85 = math.exp %84 : vector<8x128xf32>
    %cst_20 = arith.constant 1.000000e+00 : f32
    %86 = vector.broadcast %cst_20 : f32 to vector<8x128xf32>
    %87 = arith.addf %86, %85 : vector<8x128xf32>
    %88 = arith.divf %86, %87 : vector<8x128xf32>
    %89 = math.tanh %83 : vector<8x128xf32>
    %90 = vector.extract_strided_slice %88 {offsets = [0, 0], sizes = [8, 32], strides = [1, 1]} : vector<8x128xf32> to vector<8x32xf32>
    %91 = vector.extract_strided_slice %88 {offsets = [0, 32], sizes = [8, 32], strides = [1, 1]} : vector<8x128xf32> to vector<8x32xf32>
    %92 = vector.extract_strided_slice %89 {offsets = [0, 64], sizes = [8, 32], strides = [1, 1]} : vector<8x128xf32> to vector<8x32xf32>
    %93 = vector.extract_strided_slice %88 {offsets = [0, 96], sizes = [8, 32], strides = [1, 1]} : vector<8x128xf32> to vector<8x32xf32>
    %94 = arith.mulf %91, %78 : vector<8x32xf32>
    %95 = arith.mulf %90, %92 : vector<8x32xf32>
    %96 = arith.addf %94, %95 : vector<8x32xf32>
    %97 = math.tanh %96 : vector<8x32xf32>
    %98 = arith.mulf %93, %97 : vector<8x32xf32>
    %99 = vector.extract_strided_slice %5 {offsets = [40, 0], sizes = [8, 128], strides = [1, 1]} : vector<64x128xf32> to vector<8x128xf32>
    %cst_21 = arith.constant dense<0.000000e+00> : vector<8x128xf32>
    %100 = tpu.matmul %98, %6, %cst_21 {dimension_numbers = #tpu.dot_dimension_numbers<[1], [0], [0], [1], [0, 0, 1, 1], [], []>, precision = #tpu.contract_precision<fp32>} : vector<8x32xf32>, vector<32x128xf32>, vector<8x128xf32> -> vector<8x128xf32>
    %101 = arith.addf %99, %100 : vector<8x128xf32>
    %102 = arith.negf %101 : vector<8x128xf32>
    %103 = math.exp %102 : vector<8x128xf32>
    %cst_22 = arith.constant 1.000000e+00 : f32
    %104 = vector.broadcast %cst_22 : f32 to vector<8x128xf32>
    %105 = arith.addf %104, %103 : vector<8x128xf32>
    %106 = arith.divf %104, %105 : vector<8x128xf32>
    %107 = math.tanh %101 : vector<8x128xf32>
    %108 = vector.extract_strided_slice %106 {offsets = [0, 0], sizes = [8, 32], strides = [1, 1]} : vector<8x128xf32> to vector<8x32xf32>
    %109 = vector.extract_strided_slice %106 {offsets = [0, 32], sizes = [8, 32], strides = [1, 1]} : vector<8x128xf32> to vector<8x32xf32>
    %110 = vector.extract_strided_slice %107 {offsets = [0, 64], sizes = [8, 32], strides = [1, 1]} : vector<8x128xf32> to vector<8x32xf32>
    %111 = vector.extract_strided_slice %106 {offsets = [0, 96], sizes = [8, 32], strides = [1, 1]} : vector<8x128xf32> to vector<8x32xf32>
    %112 = arith.mulf %109, %96 : vector<8x32xf32>
    %113 = arith.mulf %108, %110 : vector<8x32xf32>
    %114 = arith.addf %112, %113 : vector<8x32xf32>
    %115 = math.tanh %114 : vector<8x32xf32>
    %116 = arith.mulf %111, %115 : vector<8x32xf32>
    %117 = vector.extract_strided_slice %5 {offsets = [48, 0], sizes = [8, 128], strides = [1, 1]} : vector<64x128xf32> to vector<8x128xf32>
    %cst_23 = arith.constant dense<0.000000e+00> : vector<8x128xf32>
    %118 = tpu.matmul %116, %6, %cst_23 {dimension_numbers = #tpu.dot_dimension_numbers<[1], [0], [0], [1], [0, 0, 1, 1], [], []>, precision = #tpu.contract_precision<fp32>} : vector<8x32xf32>, vector<32x128xf32>, vector<8x128xf32> -> vector<8x128xf32>
    %119 = arith.addf %117, %118 : vector<8x128xf32>
    %120 = arith.negf %119 : vector<8x128xf32>
    %121 = math.exp %120 : vector<8x128xf32>
    %cst_24 = arith.constant 1.000000e+00 : f32
    %122 = vector.broadcast %cst_24 : f32 to vector<8x128xf32>
    %123 = arith.addf %122, %121 : vector<8x128xf32>
    %124 = arith.divf %122, %123 : vector<8x128xf32>
    %125 = math.tanh %119 : vector<8x128xf32>
    %126 = vector.extract_strided_slice %124 {offsets = [0, 0], sizes = [8, 32], strides = [1, 1]} : vector<8x128xf32> to vector<8x32xf32>
    %127 = vector.extract_strided_slice %124 {offsets = [0, 32], sizes = [8, 32], strides = [1, 1]} : vector<8x128xf32> to vector<8x32xf32>
    %128 = vector.extract_strided_slice %125 {offsets = [0, 64], sizes = [8, 32], strides = [1, 1]} : vector<8x128xf32> to vector<8x32xf32>
    %129 = vector.extract_strided_slice %124 {offsets = [0, 96], sizes = [8, 32], strides = [1, 1]} : vector<8x128xf32> to vector<8x32xf32>
    %130 = arith.mulf %127, %114 : vector<8x32xf32>
    %131 = arith.mulf %126, %128 : vector<8x32xf32>
    %132 = arith.addf %130, %131 : vector<8x32xf32>
    %133 = math.tanh %132 : vector<8x32xf32>
    %134 = arith.mulf %129, %133 : vector<8x32xf32>
    %135 = vector.extract_strided_slice %5 {offsets = [56, 0], sizes = [8, 128], strides = [1, 1]} : vector<64x128xf32> to vector<8x128xf32>
    %cst_25 = arith.constant dense<0.000000e+00> : vector<8x128xf32>
    %136 = tpu.matmul %134, %6, %cst_25 {dimension_numbers = #tpu.dot_dimension_numbers<[1], [0], [0], [1], [0, 0, 1, 1], [], []>, precision = #tpu.contract_precision<fp32>} : vector<8x32xf32>, vector<32x128xf32>, vector<8x128xf32> -> vector<8x128xf32>
    %137 = arith.addf %135, %136 : vector<8x128xf32>
    %138 = arith.negf %137 : vector<8x128xf32>
    %139 = math.exp %138 : vector<8x128xf32>
    %cst_26 = arith.constant 1.000000e+00 : f32
    %140 = vector.broadcast %cst_26 : f32 to vector<8x128xf32>
    %141 = arith.addf %140, %139 : vector<8x128xf32>
    %142 = arith.divf %140, %141 : vector<8x128xf32>
    %143 = math.tanh %137 : vector<8x128xf32>
    %144 = vector.extract_strided_slice %142 {offsets = [0, 0], sizes = [8, 32], strides = [1, 1]} : vector<8x128xf32> to vector<8x32xf32>
    %145 = vector.extract_strided_slice %142 {offsets = [0, 32], sizes = [8, 32], strides = [1, 1]} : vector<8x128xf32> to vector<8x32xf32>
    %146 = vector.extract_strided_slice %143 {offsets = [0, 64], sizes = [8, 32], strides = [1, 1]} : vector<8x128xf32> to vector<8x32xf32>
    %147 = vector.extract_strided_slice %142 {offsets = [0, 96], sizes = [8, 32], strides = [1, 1]} : vector<8x128xf32> to vector<8x32xf32>
    %148 = arith.mulf %145, %132 : vector<8x32xf32>
    %149 = arith.mulf %144, %146 : vector<8x32xf32>
    %150 = arith.addf %148, %149 : vector<8x32xf32>
    %151 = math.tanh %150 : vector<8x32xf32>
    %152 = arith.mulf %147, %151 : vector<8x32xf32>
    %153 = tpu.concatenate %26, %44, %62, %80, %98, %116, %134, %152 in 0 : vector<8x32xf32>, vector<8x32xf32>, vector<8x32xf32>, vector<8x32xf32>, vector<8x32xf32>, vector<8x32xf32>, vector<8x32xf32>, vector<8x32xf32> -> vector<64x32xf32>
    %c0_27 = arith.constant 0 : index
    %c0_28 = arith.constant 0 : index
    %154 = vector.load %arg6[%c0_27, %c0_28] : memref<32x32xf32, #tpu.memory_space<vmem>>, vector<32x32xf32>
    %cst_29 = arith.constant dense<0.000000e+00> : vector<64x32xf32>
    %155 = tpu.matmul %153, %154, %cst_29 {dimension_numbers = #tpu.dot_dimension_numbers<[1], [0], [0], [1], [0, 0, 1, 1], [], []>, precision = #tpu.contract_precision<fp32>} : vector<64x32xf32>, vector<32x32xf32>, vector<64x32xf32> -> vector<64x32xf32>
    %c0_30 = arith.constant 0 : index
    %c0_31 = arith.constant 0 : index
    %156 = vector.load %arg7[%c0_30, %c0_31] : memref<1x32xf32, #tpu.memory_space<vmem>>, vector<1x32xf32>
    %157 = vector.broadcast %156 : vector<1x32xf32> to vector<64x32xf32>
    %158 = arith.addf %155, %157 : vector<64x32xf32>
    %cst_32 = arith.constant 0.000000e+00 : f32
    %159 = vector.broadcast %cst_32 : f32 to vector<64x32xf32>
    %160 = arith.maximumf %158, %159 : vector<64x32xf32>
    %c0_33 = arith.constant 0 : index
    %c0_34 = arith.constant 0 : index
    %161 = vector.load %arg8[%c0_33, %c0_34] : memref<1x32xf32, #tpu.memory_space<vmem>>, vector<1x32xf32>
    %162 = vector.broadcast %161 : vector<1x32xf32> to vector<64x32xf32>
    %163 = arith.mulf %160, %162 : vector<64x32xf32>
    %cst_35 = arith.constant dense<0.000000e+00> : vector<64xf32>
    %164 = vector.multi_reduction <add>, %163, %cst_35 [1] : vector<64x32xf32> to vector<64xf32>
    %165 = vector.shape_cast %164 : vector<64xf32> to vector<64x1xf32>
    %c0_36 = arith.constant 0 : index
    %166 = memref.load %arg9[%c0_36] : memref<1xf32, #tpu.memory_space<smem>>
    %167 = vector.broadcast %166 : f32 to vector<64x1xf32>
    %168 = arith.addf %165, %167 : vector<64x1xf32>
    %169 = vector.shape_cast %168 : vector<64x1xf32> to vector<64x1xf32>
    %170 = vector.broadcast %169 : vector<64x1xf32> to vector<64x128xf32>
    %c0_37 = arith.constant 0 : index
    %c0_38 = arith.constant 0 : index
    %171 = vector.load %arg10[%c0_37, %c0_38] : memref<64x128xf32, #tpu.memory_space<vmem>>, vector<64x128xf32>
    tpu.vector_store %arg10[%c0_37, %c0_38], %170 {strides = array<i32>} : memref<64x128xf32, #tpu.memory_space<vmem>>, vector<64x128xf32>,
    return
  }
}

</mosaic_0001>

<bundles_post_ra>
// kernel: squeeze.5
= control target key start
LH: loop header
LB: loop body
LE: loop exit
PB: predicated region body
PF: predicated region fallthrough
CT: control target
= control target key end

     0   :  { %s66_s8 = smov 104   ;;  %vm7_vm0 = vcmask 64512   ;;  %s67_s11 = smov 112   ;;  %s117_s0 = inlined_call_operand.vmem [shape: f32[64], index: 0, kind: input, shape index: {}]   ;;  %s118_s1 = inlined_call_operand.vmem [shape: f32[8,8], index: 1, kind: output, shape index: {}]  }
   0x1   :  { %v4_v0 = vld [vmem:[%s117_s0] sm:$0x1]  ;;  %s65_s0 = smov 120   ;;  %s68_s12 = smov 96  }
   0x2   :  { %5 = vst [vmem:[#allocation0] sm:$0x1] %v4_v0  ;;  %s69_s13 = smov 88   ;;  %s70_s14 = smov 80  }
   0x3   :  { %s71_s15 = smov 72  }
   0x9   :  { %v9_v1 = vld [vmem:[#allocation0] sm:$0x1]  }
   0xa   :  { %v21_v2 = vld [vmem:[#allocation0] sm:$0x1]   ;;  %10 = vrot.lane.b32.xlu0 %v9_v1, %s65_s0 }
   0xb   :  { %22 = vrot.lane.b32.xlu1 %v21_v2, %s66_s8  ;;  %v15_v3 = vld [vmem:[#allocation0] sm:$0x1]  }
   0xc   :  { %v27_v4 = vld [vmem:[#allocation0] sm:$0x1]  }
   0xd   :  { %v6_v5 = vld [vmem:[#allocation0] sm:$0x1]  }
   0xe   :  { %8 = vst.msk [vmem:[%s118_s1] sm:$0x1] %vm7_vm0, %v6_v5   ;;  %16 = vrot.lane.b32.xlu0 %v15_v3, %s67_s11  ;;  %v33_v6 = vld [vmem:[#allocation0] sm:$0x1]  }
   0xf   :  { %28 = vrot.lane.b32.xlu1 %v27_v4, %s68_s12  ;;  %v39_v7 = vld [vmem:[#allocation0] sm:$0x1]  }
  0x10   :  { %v45_v8 = vld [vmem:[#allocation0] sm:$0x1]  }
  0x12   :  { %34 = vrot.lane.b32.xlu0 %v33_v6, %s69_s13 }
  0x13   :  { %40 = vrot.lane.b32.xlu1 %v39_v7, %s70_s14 }
  0x16   :  { %46 = vrot.lane.b32.xlu0 %v45_v8, %s71_s15 }
  0x7c   :  { %v11_v9 = vpop.permute.xlu0 %10  }
  0x7d   :  { %v23_v10 = vpop.permute.xlu1 %22   ;;  %51 = vst.msk [vmem:[%s118_s1 + $0x1] sm:$0x1] %vm7_vm0, %v11_v9  }
  0x7e   :  { %53 = vst.msk [vmem:[%s118_s1 + $0x3] sm:$0x1] %vm7_vm0, %v23_v10  }
  0x80   :  { %v17_v11 = vpop.permute.xlu0 %16  }
  0x81   :  { %v29_v12 = vpop.permute.xlu1 %28   ;;  %52 = vst.msk [vmem:[%s118_s1 + $0x2] sm:$0x1] %vm7_vm0, %v17_v11  }
  0x82   :  { %54 = vst.msk [vmem:[%s118_s1 + $0x4] sm:$0x1] %vm7_vm0, %v29_v12  }
  0x84   :  { %v35_v13 = vpop.permute.xlu0 %34  }
  0x85   :  { %v41_v14 = vpop.permute.xlu1 %40   ;;  %55 = vst.msk [vmem:[%s118_s1 + $0x5] sm:$0x1] %vm7_vm0, %v35_v13  }
  0x86   :  { %56 = vst.msk [vmem:[%s118_s1 + $0x6] sm:$0x1] %vm7_vm0, %v41_v14  }
  0x88   :  { %v47_v15 = vpop.permute.xlu0 %46  }
  0x89   :  { %57 = vst.msk [vmem:[%s118_s1 + $0x7] sm:$0x1] %vm7_vm0, %v47_v15  }

// kernel: critic_forward.1
= control target key start
LH: loop header
LB: loop body
LE: loop exit
PB: predicated region body
PF: predicated region fallthrough
CT: control target
= control target key end

     0   :  { %vm53_vm0 = vcmask 130048   ;;  %vm844_vm1 = vcmask 261120   ;;  %vm7571_vm2 = vmmov 0   ;;  %s7574_s23 = smov 32   ;;  %s8458_s3 = inlined_call_operand.vmem [shape: f32[16,128], index: 3, kind: input, shape index: {}]   ;;  %s8459_s0 = inlined_call_operand.vmem [shape: f32[64,16], index: 0, kind: input, shape index: {}]   ;;  %s8460_s4 = inlined_call_operand.vmem [shape: f32[32,128], index: 4, kind: input, shape index: {}]   ;;  %s8461_s1 = inlined_call_operand.vmem [shape: f32[8,32], index: 1, kind: input, shape index: {}]   ;;  %s8462_s5 = inlined_call_operand.vmem [shape: f32[1,128], index: 5, kind: input, shape index: {}]   ;;  %s8463_s2 = inlined_call_operand.vmem [shape: f32[8,32], index: 2, kind: input, shape index: {}]   ;;  %s8464_s6 = inlined_call_operand.vmem [shape: f32[32,32], index: 6, kind: input, shape index: {}]   ;;  %s8465_s7 = inlined_call_operand.vmem [shape: f32[1,32], index: 7, kind: input, shape index: {}]   ;;  %s8466_s8 = inlined_call_operand.vmem [shape: f32[1,32], index: 8, kind: input, shape index: {}]   ;;  %s8467_s9 = inlined_call_operand.<no memory space> [shape: f32[1], index: 9, kind: input, shape index: {}]   ;;  %s8468_s10 = inlined_call_operand.vmem [shape: f32[64,128], index: 10, kind: output, shape index: {}]  }
   0x1   :  { %v44_v0 = vld [vmem:[%s8458_s3] sm:$0xff]  ;;  %v45_v1 = vld [vmem:[%s8458_s3 + $0x8] sm:$0xff]  ;;  %v38_v7 = vld [vmem:[%s8459_s0 + $0x10] sm:$0xff] }
   0x2   :  { %v36_v2 = vld [vmem:[%s8459_s0] sm:$0xff]  ;;  %v79_v3 = vand.u32 4294901760, %v44_v0  ;;  %v82_v4 = vand.u32 4294901760, %v45_v1  ;;  %v37_v6 = vld [vmem:[%s8459_s0 + $0x8] sm:$0xff]  ;;  %v39_v8 = vld [vmem:[%s8459_s0 + $0x18] sm:$0xff]  ;;  %v61_v11 = vsel %vm53_vm0, %v38_v7, 0 }
   0x3   :  { %v55_v5 = vsel %vm53_vm0, %v36_v2, 0  ;;  %v58_v10 = vsel %vm53_vm0, %v37_v6, 0  ;;  %v64_v12 = vsel %vm53_vm0, %v39_v8, 0  ;;  %v40_v13 = vld [vmem:[%s8459_s0 + $0x20] sm:$0xff]  ;;  %v41_v18 = vld [vmem:[%s8459_s0 + $0x28] sm:$0xff]  ;;  %v7667_v20 = vand.u32 4294901760, %v61_v11 }
   0x4   :  { %v7649_v9 = vand.u32 4294901760, %v55_v5  ;;  %v7657_v14 = vpack.c.bf16 %v82_v4, %v79_v3  ;;  %v7659_v15 = vand.u32 4294901760, %v58_v10  ;;  %v227_v16 = vsub.f32 %v44_v0, %v79_v3  ;;  %v42_v39 = vld [vmem:[%s8459_s0 + $0x30] sm:$0xff]  ;;  %v43_v48 = vld [vmem:[%s8459_s0 + $0x38] sm:$0xff] }
   0x5   :  { %v234_v17 = vsub.f32 %v45_v1, %v82_v4  ;;  %v7669_v21 = vand.u32 4294901760, %v64_v12  ;;  %v67_v22 = vsel %vm53_vm0, %v40_v13, 0  ;;  %v7683_v28 = vsub.f32 %v61_v11, %v7667_v20  ;;  %v839_v11 = vld [vmem:[%s8460_s4 + $0x8] sm:$0xff] }
   0x6   :  { %v7665_v19 = vsub.f32 %v55_v5, %v7649_v9  ;;  %6966 = vmatprep.subr.bf16.mxu1 %v7657_v14  ;;  %6978 = vmatprep.subr.bf16.mxu0 %v7657_v14  ;;  %v7675_v23 = vsub.f32 %v58_v10, %v7659_v15  ;;  %v228_v24 = vand.u32 4294901760, %v227_v16  ;;  %v7677_v26 = vand.u32 4294901760, %v67_v22  ;;  %v838_v10 = vld [vmem:[%s8460_s4] sm:$0xff] }
   0x7   :  { %v235_v25 = vand.u32 4294901760, %v234_v17  ;;  %6968 = vmatpush3.bf16.msra.mxu1 %v7657_v14  ;;  %6980 = vmatpush3.bf16.msra.mxu0 %v7657_v14  ;;  %v7686_v29 = vsub.f32 %v64_v12, %v7669_v21  ;;  %v70_v30 = vsel %vm53_vm0, %v41_v18, 0  ;;  %v167_v36 = vand.u32 4294901760, %v7683_v28  ;;  %v842_v12 = vld [vmem:[%s8461_s1] sm:$0xff] }
   0x8   :  { %v147_v27 = vand.u32 4294901760, %v7665_v19  ;;  %v157_v31 = vand.u32 4294901760, %v7675_v23  ;;  %v229_v32 = vsub.f32 %v227_v16, %v228_v24  ;;  %v7691_v34 = vsub.f32 %v67_v22, %v7677_v26 }
   0x9   :  { %v236_v33 = vsub.f32 %v234_v17, %v235_v25  ;;  %v177_v37 = vand.u32 4294901760, %v7686_v29  ;;  %v7696_v38 = vand.u32 4294901760, %v70_v30  ;;  %v168_v45 = vsub.f32 %v7683_v28, %v167_v36 }
   0xa   :  { %v148_v35 = vsub.f32 %v7665_v19, %v147_v27  ;;  %6273 = vmatprep.mubr.f32.mxu0 %v147_v27  ;;  %v158_v40 = vsub.f32 %v7675_v23, %v157_v31  ;;  %v230_v41 = vand.u32 4294901760, %v229_v32  ;;  %v187_v43 = vand.u32 4294901760, %v7691_v34 }
   0xb   :  { %v237_v42 = vand.u32 4294901760, %v236_v33  ;;  %6274 = vmatmul.mubr.f32.vlgmr.msra.gmra.mrb[0].mxu0 %v157_v31  ;;  %v178_v46 = vsub.f32 %v7686_v29, %v177_v37  ;;  %v7706_v47 = vsub.f32 %v70_v30, %v7696_v38  ;;  %v73_v52 = vsel %vm53_vm0, %v42_v39, 0 }
   0xc   :  { %v149_v44 = vand.u32 4294901760, %v148_v35  ;;  %6276 = vmatprep.mubr.f32.mxu0 %v167_v36  ;;  %v159_v49 = vand.u32 4294901760, %v158_v40  ;;  %v188_v51 = vsub.f32 %v7691_v34, %v187_v43  ;;  %v169_v53 = vand.u32 4294901760, %v168_v45 }
   0xd   :  { %v6969_v50 = vpack.c.bf16 %v237_v42, %v230_v41  ;;  %v197_v54 = vand.u32 4294901760, %v7706_v47  ;;  %v7714_v55 = vand.u32 4294901760, %v73_v52  ;;  %v179_v56 = vand.u32 4294901760, %v178_v46 }
   0xe   :  { %6225 = vmatprep.mubr.f32.mxu1 %v149_v44  ;;  %v76_v57 = vsel %vm53_vm0, %v43_v48, 0  ;;  %v6981_v58 = vpack.c.bf16 %v235_v25, %v228_v24  ;;  %v6973_v59 = vpack.c.bf16 %v234_v17, %v227_v16  ;;  %v189_v60 = vand.u32 4294901760, %v188_v51  ;;  %v840_v16 = vld [vmem:[%s8460_s4 + $0x10] sm:$0xff]  ;;  %v841_v17 = vld [vmem:[%s8460_s4 + $0x18] sm:$0xff] }
   0xf   :  { %6226 = vmatmul.mubr.f32.vlgmr.msra.gmra.mrb[0].mxu1 %v159_v49  ;;  %6970 = vmatprep.subr.bf16.mxu1 %v6969_v50  ;;  %v198_v61 = vsub.f32 %v7706_v47, %v197_v54  ;;  %v7719_v62 = vsub.f32 %v73_v52, %v7714_v55  ;;  %v7721_v63 = vand.u32 4294901760, %v76_v57  ;;  %v7570_v8 = vmov 0.0|0.0   ;;  %v5838_v49 = vld [vmem:[%s8462_s5] ss:$0 sm:$0xff]  ;;  %s7573_s5 = smov 64  }
  0x10   :  { %6972 = vmatpush3.bf16.msra.mxu1 %v6969_v50  ;;  %6228 = vmatprep.mubr.f32.mxu1 %v169_v53  ;;  %v849_v13 = vand.u32 4294901760, %v838_v10  ;;  %v846_v18 = vsel %vm844_vm1, %v842_v12, 0  ;;  %v855_v22 = vand.u32 4294901760, %v840_v16  ;;  %v858_v24 = vand.u32 4294901760, %v841_v17 }
  0x11   :  { %6277 = vmatmul.mubr.f32.gmra.mrb[2].mxu0 %v177_v37  ;;  %6982 = vmatprep.subr.bf16.mxu0 %v6981_v58  ;;  %v207_v0 = vand.u32 4294901760, %v7719_v62  ;;  %v7725_v1 = vsub.f32 %v76_v57, %v7721_v63  ;;  %v199_v2 = vand.u32 4294901760, %v198_v61  ;;  %v7767_v25 = vand.u32 4294901760, %v846_v18 }
  0x12   :  { %6279 = vmatprep.mubr.f32.mxu0 %v187_v43  ;;  %6984 = vmatpush3.bf16.msra.mxu0 %v6981_v58  ;;  %v7772_v30 = vsub.f32 %v838_v10, %v849_v13  ;;  %v950_v33 = vsub.f32 %v841_v17, %v858_v24  ;;  %v7572_v40 = vmov 0.0  }
  0x13   :  { %6229 = vmatmul.mubr.f32.gmra.mrb[2].mxu1 %v179_v56  ;;  %6974 = vmatprep.subr.bf16.mxu1 %v6973_v59  ;;  %v208_v3 = vsub.f32 %v7719_v62, %v207_v0  ;;  %v217_v4 = vand.u32 4294901760, %v7725_v1  ;;  %v7783_v32 = vsub.f32 %v846_v18, %v7767_v25 }
  0x14   :  { %6231 = vmatprep.mubr.f32.mxu1 %v189_v60  ;;  %6986 = vmatprep.subr.bf16.mxu0 %v7657_v14  ;;  %v951_v36 = vand.u32 4294901760, %v950_v33 }
  0x15   :  { %6280 = vmatmul.mubr.f32.gmra.mrb[4].mxu0 %v197_v54  ;;  %v209_v5 = vand.u32 4294901760, %v208_v3  ;;  %v218_v6 = vsub.f32 %v7725_v1, %v217_v4 }
  0x16   :  { %6282 = vmatprep.mubr.f32.mxu0 %v207_v0  ;;  %v952_v39 = vsub.f32 %v950_v33, %v951_v36 }
  0x17   :  { %6232 = vmatmul.mubr.f32.gmra.mrb[4].mxu1 %v199_v2  ;;  %v219_v7 = vand.u32 4294901760, %v218_v6 }
  0x18   :  { %6234 = vmatprep.mubr.f32.mxu1 %v209_v5  ;;  %v953_v43 = vand.u32 4294901760, %v952_v39 }
  0x19   :  { %6283 = vmatmul.mubr.f32.gmra.mrb[6].mxu0 %v217_v4 }
  0x1a   :  { %6289 = vmatprep.mubr.f32.mxu0 %v7649_v9 }
  0x1b   :  { %6235 = vmatmul.mubr.f32.gmra.mrb[6].mxu1 %v219_v7 }
  0x1c   :  { %6241 = vmatprep.mubr.f32.mxu1 %v7649_v9 }
  0x1d   :  { %6290 = vmatmul.mubr.f32.vlgmr.msra.gmra.mrb[0].mxu0 %v7659_v15 }
  0x1e   :  { %6292 = vmatprep.mubr.f32.mxu0 %v7667_v20  ;;  %6988 = vmatpush3.bf16.msra.mxu0 %v7657_v14  ;;  %v852_v14 = vand.u32 4294901760, %v839_v11 }
  0x1f   :  { %6242 = vmatmul.mubr.f32.vlgmr.msra.gmra.mrb[0].mxu1 %v7659_v15  ;;  %7061 = vmatprep.subr.bf16.mxu0 %v7570_v8 }
  0x20   :  { %6976 = vmatpush3.bf16.msra.mxu1 %v6973_v59  ;;  %6244 = vmatprep.mubr.f32.mxu1 %v7667_v20  ;;  %v7770_v27 = vpack.c.bf16 %v852_v14, %v849_v13  ;;  %v7774_v31 = vsub.f32 %v839_v11, %v852_v14 }
  0x21   :  { %6293 = vmatmul.mubr.f32.gmra.mrb[2].mxu0 %v7669_v21  ;;  %6989 = vmatprep.subr.bf16.mxu1 %v7570_v8 }
  0x22   :  { %6295 = vmatprep.mubr.f32.mxu0 %v7677_v26  ;;  %v7824_v45 = vpack.c.bf16 %v7774_v31, %v7772_v30 }
  0x23   :  { %6245 = vmatmul.mubr.f32.gmra.mrb[2].mxu1 %v7669_v21 }
  0x24   :  { %6247 = vmatprep.mubr.f32.mxu1 %v7677_v26 }
  0x25   :  { %6296 = vmatmul.mubr.f32.gmra.mrb[4].mxu0 %v7696_v38 }
  0x26   :  { %6298 = vmatprep.mubr.f32.mxu0 %v7714_v55 }
  0x27   :  { %6248 = vmatmul.mubr.f32.gmra.mrb[4].mxu1 %v7696_v38 }
  0x28   :  { %6250 = vmatprep.mubr.f32.mxu1 %v7714_v55 }
  0x29   :  { %6299 = vmatmul.mubr.f32.gmra.mrb[6].mxu0 %v7721_v63 }
  0x2a   :  { %6305 = vmatprep.mubr.f32.mxu0 %v7649_v9  ;;  %v7780_v9 = vpack.c.bf16 %v858_v24, %v855_v22 }
  0x2b   :  { %6251 = vmatmul.mubr.f32.gmra.mrb[6].mxu1 %v7721_v63 }
  0x2c   :  { %6257 = vmatprep.mubr.f32.mxu1 %v7665_v19  ;;  %v930_v19 = vand.u32 4294901760, %v7772_v30 }
  0x2d   :  { %6306 = vmatmul.mubr.f32.vlgmr.msra.gmra.mrb[0].mxu0 %v7659_v15  ;;  %v937_v15 = vand.u32 4294901760, %v7774_v31 }
  0x2e   :  { %6308 = vmatprep.mubr.f32.mxu0 %v7667_v20  ;;  %7063 = vmatpush3.bf16.msra.mxu0 %v7770_v27  ;;  %v943_v20 = vsub.f32 %v840_v16, %v855_v22 }
  0x2f   :  { %6258 = vmatmul.mubr.f32.vlgmr.msra.gmra.mrb[0].mxu1 %v7675_v23  ;;  %7064 = vmatprep.subr.bf16.mxu0 %v7570_v8  ;;  %v919_v23 = vand.u32 4294901760, %v7783_v32 }
  0x30   :  { %6991 = vmatpush3.bf16.msra.mxu1 %v7770_v27  ;;  %6260 = vmatprep.mubr.f32.mxu1 %v7683_v28  ;;  %v931_v28 = vsub.f32 %v7772_v30, %v930_v19  ;;  %v944_v35 = vand.u32 4294901760, %v943_v20  ;;  %v7829_v46 = vpack.c.bf16 %v950_v33, %v943_v20 }
  0x31   :  { %6309 = vmatmul.mubr.f32.gmra.mrb[2].mxu0 %v7669_v21  ;;  %6992 = vmatprep.subr.bf16.mxu1 %v7570_v8  ;;  %v938_v21 = vsub.f32 %v7774_v31, %v937_v15 }
  0x32   :  { %6311 = vmatprep.mubr.f32.mxu0 %v7677_v26  ;;  %7066 = vmatpush3.bf16.msra.mxu0 %v7780_v9  ;;  %v920_v26 = vsub.f32 %v7783_v32, %v919_v23  ;;  %v945_v37 = vsub.f32 %v943_v20, %v944_v35  ;;  %v7846_v48 = vpack.c.bf16 %v951_v36, %v944_v35 }
  0x33   :  { %6261 = vmatmul.mubr.f32.gmra.mrb[2].mxu1 %v7686_v29  ;;  %7067 = vmatprep.subr.bf16.mxu0 %v7570_v8  ;;  %v932_v29 = vand.u32 4294901760, %v931_v28 }
  0x34   :  { %6263 = vmatprep.mubr.f32.mxu1 %v7691_v34  ;;  %6994 = vmatpush3.bf16.msra.mxu1 %v7780_v9  ;;  %v939_v34 = vand.u32 4294901760, %v938_v21  ;;  %v946_v42 = vand.u32 4294901760, %v945_v37 }
  0x35   :  { %6312 = vmatmul.mubr.f32.gmra.mrb[4].mxu0 %v7696_v38  ;;  %6995 = vmatprep.subr.bf16.mxu1 %v7570_v8  ;;  %v921_v38 = vand.u32 4294901760, %v920_v26 }
  0x36   :  { %6314 = vmatprep.mubr.f32.mxu0 %v7714_v55  ;;  %v7813_v41 = vpack.c.bf16 %v939_v34, %v932_v29  ;;  %v7816_v44 = vpack.c.bf16 %v953_v43, %v946_v42 }
  0x37   :  { %6264 = vmatmul.mubr.f32.gmra.mrb[4].mxu1 %v7706_v47  ;;  %v7842_v47 = vpack.c.bf16 %v937_v15, %v930_v19  ;;  %v843_v19 = vld [vmem:[%s8463_s2] sm:$0xff] }
  0x38   :  { %6266 = vmatprep.mubr.f32.mxu1 %v7719_v62 }
  0x39   :  { %6315 = vmatmul.mubr.f32.gmra.mrb[6].mxu0 %v7721_v63 }
  0x3a   :  { %6457 = vmatprep.mubr.msk.f32.mxu0 %vm7571_vm2, %v7572_v40 }
  0x3b   :  { %6267 = vmatmul.mubr.f32.gmra.mrb[6].mxu1 %v7725_v1 }
  0x3c   :  { %6325 = vmatprep.mubr.msk.f32.mxu1 %vm7571_vm2, %v7572_v40 }
  0x3f   :  { %6326 = vmatmul.mubr.f32.vlgmr.msra.gmra.mrb[8].mxu1 %v921_v38 }
  0x40   :  { %6997 = vmatpush3.bf16.msra.mxu1 %v7813_v41  ;;  %6336 = vmatprep.mubr.msk.f32.mxu1 %vm7571_vm2, %v7572_v40 }
  0x41   :  { %6998 = vmatprep.subr.bf16.mxu1 %v7570_v8 }
  0x44   :  { %7000 = vmatpush3.bf16.msra.mxu1 %v7816_v44 }
  0x45   :  { %7001 = vmatprep.subr.bf16.mxu1 %v7570_v8 }
  0x47   :  { %6337 = vmatmul.mubr.f32.vlgmr.msra.gmra.mrb[8].mxu1 %v7767_v25 }
  0x48   :  { %7003 = vmatpush3.bf16.msra.mxu1 %v7824_v45  ;;  %6347 = vmatprep.mubr.msk.f32.mxu1 %vm7571_vm2, %v7572_v40 }
  0x49   :  { %7004 = vmatprep.subr.bf16.mxu1 %v7570_v8 }
  0x4c   :  { %7006 = vmatpush3.bf16.msra.mxu1 %v7829_v46 }
  0x4d   :  { %7007 = vmatprep.subr.bf16.mxu1 %v7570_v8 }
  0x4f   :  { %6348 = vmatmul.mubr.f32.vlgmr.msra.gmra.mrb[8].mxu1 %v7783_v32 }
  0x50   :  { %7009 = vmatpush3.bf16.msra.mxu1 %v7770_v27  ;;  %6358 = vmatprep.mubr.msk.f32.mxu1 %vm7571_vm2, %v7572_v40 }
  0x51   :  { %7010 = vmatprep.subr.bf16.mxu1 %v7570_v8 }
  0x54   :  { %7012 = vmatpush3.bf16.msra.mxu1 %v7780_v9 }
  0x55   :  { %7013 = vmatprep.subr.bf16.mxu1 %v7570_v8 }
  0x57   :  { %6359 = vmatmul.mubr.f32.vlgmr.msra.gmra.mrb[8].mxu1 %v919_v23 }
  0x58   :  { %7015 = vmatpush3.bf16.msra.mxu1 %v7842_v47  ;;  %6369 = vmatprep.mubr.msk.f32.mxu1 %vm7571_vm2, %v7572_v40 }
  0x59   :  { %7016 = vmatprep.subr.bf16.mxu1 %v7570_v8 }
  0x5c   :  { %7018 = vmatpush3.bf16.msra.mxu1 %v7846_v48 }
  0x5d   :  { %7019 = vmatprep.subr.bf16.mxu1 %v7570_v8 }
  0x5f   :  { %6370 = vmatmul.mubr.f32.vlgmr.msra.gmra.mrb[8].mxu1 %v7767_v25 }
  0x60   :  { %7021 = vmatpush3.bf16.msra.mxu1 %v7770_v27  ;;  %6380 = vmatprep.mubr.msk.f32.mxu1 %vm7571_vm2, %v7572_v40 }
  0x61   :  { %7022 = vmatprep.subr.bf16.mxu1 %v7570_v8 }
  0x64   :  { %7024 = vmatpush3.bf16.msra.mxu1 %v7780_v9 }
  0x65   :  { %7025 = vmatprep.subr.bf16.mxu1 %v7570_v8 }
  0x67   :  { %6381 = vmatmul.mubr.f32.vlgmr.msra.gmra.mrb[8].mxu1 %v7767_v25 }
  0x68   :  { %7027 = vmatpush3.bf16.msra.mxu1 %v7770_v27  ;;  %6391 = vmatprep.mubr.msk.f32.mxu1 %vm7571_vm2, %v7572_v40 }
  0x69   :  { %7028 = vmatprep.subr.bf16.mxu1 %v7570_v8 }
  0x6c   :  { %7030 = vmatpush3.bf16.msra.mxu1 %v7780_v9 }
  0x6d   :  { %7031 = vmatprep.subr.bf16.mxu1 %v7570_v8 }
 0x100   :  { %v6307_v50 = vpop.f32.mrb[0].mxu0 }
 0x101   :  { %v792_v51 = vpop.f32.mrb[1].mxu0 }
 0x102   :  { %v6259_v52 = vpop.f32.mrb[0].mxu1 }
 0x103   :  { %v7325_v53 = vadd.f32 %v6259_v52, %v5838_v49  ;;  %v420_v54 = vpop.f32.mrb[1].mxu1 }
 0x104   :  { %v7327_v55 = vadd.f32 %v5838_v49, %v420_v54  ;;  %v6310_v56 = vpop.f32.mrb[2].mxu0 }
 0x105   :  { %v7870_v57 = vadd.f32 %v7325_v53, %v6307_v50  ;;  %v804_v58 = vpop.f32.mrb[3].mxu0 }
 0x106   :  { %v7328_v59 = vadd.f32 %v7327_v55, %v792_v51  ;;  %v6262_v60 = vpop.f32.mrb[2].mxu1 }
 0x107   :  { %v7329_v61 = vadd.f32 %v6262_v60, %v5838_v49  ;;  %v434_v62 = vpop.f32.mrb[3].mxu1 }
 0x108   :  { %v7331_v63 = vadd.f32 %v5838_v49, %v434_v62  ;;  %v6313_v0 = vpop.f32.mrb[4].mxu0 }
 0x109   :  { %v7872_v1 = vadd.f32 %v7329_v61, %v6310_v56  ;;  %v816_v2 = vpop.f32.mrb[5].mxu0 }
 0x10a   :  { %v7874_v3 = vadd.f32 %v7331_v63, %v804_v58  ;;  %v6265_v4 = vpop.f32.mrb[4].mxu1 }
 0x10b   :  { %v7333_v5 = vadd.f32 %v6265_v4, %v5838_v49  ;;  %v448_v6 = vpop.f32.mrb[5].mxu1 }
 0x10c   :  { %v7335_v7 = vadd.f32 %v5838_v49, %v448_v6  ;;  %v6316_v10 = vpop.f32.mrb[6].mxu0 }
 0x10d   :  { %v7876_v11 = vadd.f32 %v7333_v5, %v6313_v0  ;;  %v828_v12 = vpop.f32.mrb[7].mxu0 }
 0x10e   :  { %v7878_v13 = vadd.f32 %v7335_v7, %v816_v2  ;;  %v6268_v14 = vpop.f32.mrb[6].mxu1 }
 0x10f   :  { %v7337_v16 = vadd.f32 %v6268_v14, %v5838_v49  ;;  %v462_v17 = vpop.f32.mrb[7].mxu1 }
 0x110   :  { %v7339_v18 = vadd.f32 %v5838_v49, %v462_v17 }
 0x111   :  { %v7880_v22 = vadd.f32 %v7337_v16, %v6316_v10 }
 0x112   :  { %v7882_v24 = vadd.f32 %v7339_v18, %v828_v12 }
 0x13a   :  { %v1329_v25 = vpop.f32.mrb[8].mxu1 }
 0x13b   :  { %v1333_v30 = vadd.f32 %v7328_v59, %v1329_v25  ;;  %v6382_v31 = vpop.f32.mrb[9].mxu1 }
 0x13d   :  { %7506 = vtanh.f32 %v1333_v30  ;;  %v5839_v15 = vmul.f32 -1.442695, %v1333_v30 }
 0x13f   :  { %7508 = vpow2.f32 %v5839_v15 }
 0x147   :  { %v7507_v32 = vpop.eup %7506 }
 0x148   :  { %1347 = vrot.lane.b32.xlu0 %v7507_v32, %s7573_s5 }
 0x149   :  { %v7509_v20 = vpop.eup %7508 }
 0x14a   :  { %v1337_v33 = vadd.f32 1.0, %v7509_v20 }
 0x14c   :  { %1342 = vrot.lane.b32.xlu0 %v843_v19, %s7574_s23  ;;  %7510 = vrcp.f32 %v1337_v33 }
 0x156   :  { %v7511_v23 = vpop.eup %7510 }
 0x1ba   :  { %v1348_v28 = vpop.permute.xlu0 %1347 }
 0x1bb   :  { %v1350_v21 = vmul.f32 %v7511_v23, %v1348_v28 }
 0x1bd   :  { %1352 = vrot.lane.b32.xlu1 %v1350_v21, %s7574_s23 }
 0x1be   :  { %v1343_v35 = vpop.permute.xlu0 %1342 }
 0x1bf   :  { %v1345_v36 = vmul.f32 %v7511_v23, %v1343_v35 }
 0x22f   :  { %v1353_v26 = vpop.permute.xlu1 %1352 }
 0x230   :  { %v7890_v29 = vadd.f32 %v1353_v26, %v1345_v36 }
 0x232   :  { %7512 = vtanh.f32 %v7890_v29 }
 0x23c   :  { %v7513_v34 = vpop.eup %7512 }
 0x23d   :  { %1358 = vrot.lane.b32.xlu1 %v7513_v34, %s7573_s5 }
 0x2af   :  { %v1359_v37 = vpop.permute.xlu1 %1358 }
 0x2b0   :  { %v1361_v39 = vmul.f32 %v7511_v23, %v1359_v37 }
 0x2b2   :  { %1363 = vrot.lane.b32.xlu0 %v1361_v39, %s7574_s23 }
 0x324   :  { %v1364_v38 = vpop.permute.xlu0 %1363 }
 0x325   :  { %v1365_v42 = vsel %vm844_vm1, %v1364_v38, 0 }
 0x326   :  { %v7896_v43 = vand.u32 4294901760, %v1365_v42 }
 0x328   :  { %v7899_v49 = vsub.f32 %v1365_v42, %v7896_v43 }
 0x32a   :  { %v7902_v50 = vand.u32 4294901760, %v7899_v49 }
 0x32c   :  { %v1439_v51 = vsub.f32 %v7899_v49, %v7902_v50 }
 0x32e   :  { %v7906_v52 = vand.u32 4294901760, %v1439_v51 }
 0x330   :  { %6392 = vmatmul.mubr.f32.vlgmr.msra.gmra.mrb[10].mxu1 %v7906_v52 }
 0x331   :  { %7033 = vmatpush3.bf16.msra.mxu1 %v7813_v41  ;;  %6402 = vmatprep.mubr.msk.f32.mxu1 %vm7571_vm2, %v7572_v40 }
 0x332   :  { %7034 = vmatprep.subr.bf16.mxu1 %v7570_v8 }
 0x335   :  { %7036 = vmatpush3.bf16.msra.mxu1 %v7816_v44 }
 0x336   :  { %7037 = vmatprep.subr.bf16.mxu1 %v7570_v8 }
 0x338   :  { %6403 = vmatmul.mubr.f32.vlgmr.msra.gmra.mrb[10].mxu1 %v7896_v43 }
 0x339   :  { %7039 = vmatpush3.bf16.msra.mxu1 %v7824_v45  ;;  %6413 = vmatprep.mubr.msk.f32.mxu1 %vm7571_vm2, %v7572_v40 }
 0x33a   :  { %7040 = vmatprep.subr.bf16.mxu1 %v7570_v8 }
 0x33d   :  { %7042 = vmatpush3.bf16.msra.mxu1 %v7829_v46 }
 0x33e   :  { %7043 = vmatprep.subr.bf16.mxu1 %v7570_v8 }
 0x340   :  { %6414 = vmatmul.mubr.f32.vlgmr.msra.gmra.mrb[10].mxu1 %v7899_v49 }
 0x341   :  { %7045 = vmatpush3.bf16.msra.mxu1 %v7770_v27  ;;  %6424 = vmatprep.mubr.msk.f32.mxu1 %vm7571_vm2, %v7572_v40 }
 0x342   :  { %7046 = vmatprep.subr.bf16.mxu1 %v7570_v8 }
 0x345   :  { %7048 = vmatpush3.bf16.msra.mxu1 %v7780_v9 }
 0x346   :  { %7049 = vmatprep.subr.bf16.mxu1 %v7570_v8 }
 0x348   :  { %6425 = vmatmul.mubr.f32.vlgmr.msra.gmra.mrb[10].mxu1 %v7902_v50 }
 0x349   :  { %7051 = vmatpush3.bf16.msra.mxu1 %v7842_v47  ;;  %6435 = vmatprep.mubr.msk.f32.mxu1 %vm7571_vm2, %v7572_v40 }
 0x34a   :  { %7052 = vmatprep.subr.bf16.mxu1 %v7570_v8 }
 0x34d   :  { %7054 = vmatpush3.bf16.msra.mxu1 %v7846_v48 }
 0x34e   :  { %7055 = vmatprep.subr.bf16.mxu1 %v7570_v8 }
 0x350   :  { %6436 = vmatmul.mubr.f32.vlgmr.msra.gmra.mrb[10].mxu1 %v7896_v43 }
 0x351   :  { %7057 = vmatpush3.bf16.msra.mxu1 %v7770_v27  ;;  %6446 = vmatprep.mubr.msk.f32.mxu1 %vm7571_vm2, %v7572_v40 }
 0x352   :  { %7058 = vmatprep.subr.bf16.mxu1 %v7570_v8 }
 0x355   :  { %7060 = vmatpush3.bf16.msra.mxu1 %v7780_v9 }
 0x356   :  { %7097 = vmatprep.subr.bf16.mxu1 %v7570_v8 }
 0x358   :  { %6447 = vmatmul.mubr.f32.vlgmr.msra.gmra.mrb[10].mxu1 %v7896_v43 }
 0x359   :  { %7099 = vmatpush3.bf16.msra.mxu1 %v7770_v27  ;;  %6523 = vmatprep.mubr.msk.f32.mxu1 %vm7571_vm2, %v7572_v40 }
 0x35a   :  { %7100 = vmatprep.subr.bf16.mxu1 %v7570_v8 }
 0x35d   :  { %7102 = vmatpush3.bf16.msra.mxu1 %v7780_v9 }
 0x35e   :  { %7103 = vmatprep.subr.bf16.mxu1 %v7570_v8 }
 0x42b   :  { %v1848_v53 = vpop.f32.mrb[10].mxu1 }
 0x42c   :  { %v1852_v54 = vadd.f32 %v7870_v57, %v1848_v53  ;;  %v6448_v55 = vpop.f32.mrb[11].mxu1 }
 0x42e   :  { %7514 = vtanh.f32 %v1852_v54  ;;  %v5840_v58 = vmul.f32 -1.442695, %v1852_v54 }
 0x430   :  { %7516 = vpow2.f32 %v5840_v58 }
 0x438   :  { %v7515_v56 = vpop.eup %7514 }
 0x439   :  { %1862 = vrot.lane.b32.xlu1 %v7515_v56, %s7573_s5 }
 0x43a   :  { %v7517_v59 = vpop.eup %7516 }
 0x43b   :  { %v1856_v60 = vadd.f32 1.0, %v7517_v59 }
 0x43d   :  { %7518 = vrcp.f32 %v1856_v60 }
 0x447   :  { %v7519_v61 = vpop.eup %7518 }
 0x448   :  { %v1860_v0 = vmul.f32 %v7519_v61, %v7890_v29 }
 0x4ab   :  { %v1863_v62 = vpop.permute.xlu1 %1862 }
 0x4ac   :  { %v1865_v63 = vmul.f32 %v7519_v61, %v1863_v62 }
 0x4ae   :  { %1867 = vrot.lane.b32.xlu0 %v1865_v63, %s7574_s23 }
 0x520   :  { %v1868_v2 = vpop.permute.xlu0 %1867 }
 0x521   :  { %v7954_v4 = vadd.f32 %v1868_v2, %v1860_v0 }
 0x523   :  { %7520 = vtanh.f32 %v7954_v4 }
 0x52d   :  { %v7521_v57 = vpop.eup %7520 }
 0x52e   :  { %1873 = vrot.lane.b32.xlu1 %v7521_v57, %s7573_s5 }
 0x5a0   :  { %v1874_v5 = vpop.permute.xlu1 %1873 }
 0x5a1   :  { %v1876_v6 = vmul.f32 %v7519_v61, %v1874_v5 }
 0x5a3   :  { %1878 = vrot.lane.b32.xlu0 %v1876_v6, %s7574_s23 }
 0x615   :  { %v1879_v7 = vpop.permute.xlu0 %1878 }
 0x616   :  { %v1880_v10 = vsel %vm844_vm1, %v1879_v7, 0 }
 0x617   :  { %v7960_v12 = vand.u32 4294901760, %v1880_v10 }
 0x619   :  { %v7963_v14 = vsub.f32 %v1880_v10, %v7960_v12 }
 0x61b   :  { %v7966_v16 = vand.u32 4294901760, %v7963_v14 }
 0x61d   :  { %v1954_v17 = vsub.f32 %v7963_v14, %v7966_v16 }
 0x61f   :  { %v7970_v18 = vand.u32 4294901760, %v1954_v17 }
 0x621   :  { %6458 = vmatmul.mubr.f32.vlgmr.msra.gmra.mrb[8].mxu0 %v7970_v18 }
 0x622   :  { %7069 = vmatpush3.bf16.msra.mxu0 %v7813_v41  ;;  %6468 = vmatprep.mubr.msk.f32.mxu0 %vm7571_vm2, %v7572_v40 }
 0x623   :  { %7070 = vmatprep.subr.bf16.mxu0 %v7570_v8 }
 0x626   :  { %7072 = vmatpush3.bf16.msra.mxu0 %v7816_v44 }
 0x627   :  { %7073 = vmatprep.subr.bf16.mxu0 %v7570_v8 }
 0x629   :  { %6469 = vmatmul.mubr.f32.vlgmr.msra.gmra.mrb[8].mxu0 %v7960_v12 }
 0x62a   :  { %7075 = vmatpush3.bf16.msra.mxu0 %v7824_v45  ;;  %6479 = vmatprep.mubr.msk.f32.mxu0 %vm7571_vm2, %v7572_v40 }
 0x62b   :  { %7076 = vmatprep.subr.bf16.mxu0 %v7570_v8 }
 0x62e   :  { %7078 = vmatpush3.bf16.msra.mxu0 %v7829_v46 }
 0x62f   :  { %7079 = vmatprep.subr.bf16.mxu0 %v7570_v8 }
 0x631   :  { %6480 = vmatmul.mubr.f32.vlgmr.msra.gmra.mrb[8].mxu0 %v7963_v14 }
 0x632   :  { %7081 = vmatpush3.bf16.msra.mxu0 %v7770_v27  ;;  %6490 = vmatprep.mubr.msk.f32.mxu0 %vm7571_vm2, %v7572_v40 }
 0x633   :  { %7082 = vmatprep.subr.bf16.mxu0 %v7570_v8 }
 0x636   :  { %7084 = vmatpush3.bf16.msra.mxu0 %v7780_v9 }
 0x637   :  { %7085 = vmatprep.subr.bf16.mxu0 %v7570_v8 }
 0x639   :  { %6491 = vmatmul.mubr.f32.vlgmr.msra.gmra.mrb[8].mxu0 %v7966_v16 }
 0x63a   :  { %7087 = vmatpush3.bf16.msra.mxu0 %v7842_v47  ;;  %6501 = vmatprep.mubr.msk.f32.mxu0 %vm7571_vm2, %v7572_v40 }
 0x63b   :  { %7088 = vmatprep.subr.bf16.mxu0 %v7570_v8 }
 0x63e   :  { %7090 = vmatpush3.bf16.msra.mxu0 %v7846_v48 }
 0x63f   :  { %7091 = vmatprep.subr.bf16.mxu0 %v7570_v8 }
 0x641   :  { %6502 = vmatmul.mubr.f32.vlgmr.msra.gmra.mrb[8].mxu0 %v7960_v12 }
 0x642   :  { %7093 = vmatpush3.bf16.msra.mxu0 %v7770_v27  ;;  %6512 = vmatprep.mubr.msk.f32.mxu0 %vm7571_vm2, %v7572_v40 }
 0x643   :  { %7094 = vmatprep.subr.bf16.mxu0 %v7570_v8 }
 0x646   :  { %7096 = vmatpush3.bf16.msra.mxu0 %v7780_v9 }
 0x647   :  { %7133 = vmatprep.subr.bf16.mxu0 %v7570_v8 }
 0x649   :  { %6513 = vmatmul.mubr.f32.vlgmr.msra.gmra.mrb[8].mxu0 %v7960_v12 }
 0x64a   :  { %7135 = vmatpush3.bf16.msra.mxu0 %v7770_v27  ;;  %6589 = vmatprep.mubr.msk.f32.mxu0 %vm7571_vm2, %v7572_v40 }
 0x64b   :  { %7136 = vmatprep.subr.bf16.mxu0 %v7570_v8 }
 0x64e   :  { %7138 = vmatpush3.bf16.msra.mxu0 %v7780_v9 }
 0x64f   :  { %7139 = vmatprep.subr.bf16.mxu0 %v7570_v8 }
 0x71c   :  { %v2363_v25 = vpop.f32.mrb[8].mxu0 }
 0x71d   :  { %v2367_v30 = vadd.f32 %v7874_v3, %v2363_v25  ;;  %v6514_v31 = vpop.f32.mrb[9].mxu0 }
 0x71f   :  { %7522 = vtanh.f32 %v2367_v30  ;;  %v5841_v19 = vmul.f32 -1.442695, %v2367_v30 }
 0x721   :  { %7524 = vpow2.f32 %v5841_v19 }
 0x729   :  { %v7523_v32 = vpop.eup %7522 }
 0x72a   :  { %2377 = vrot.lane.b32.xlu1 %v7523_v32, %s7573_s5 }
 0x72b   :  { %v7525_v15 = vpop.eup %7524 }
 0x72c   :  { %v2371_v20 = vadd.f32 1.0, %v7525_v15 }
 0x72e   :  { %7526 = vrcp.f32 %v2371_v20 }
 0x738   :  { %v7527_v33 = vpop.eup %7526 }
 0x739   :  { %v2375_v21 = vmul.f32 %v7527_v33, %v7954_v4 }
 0x79c   :  { %v2378_v23 = vpop.permute.xlu1 %2377 }
 0x79d   :  { %v2380_v28 = vmul.f32 %v7527_v33, %v2378_v23 }
 0x79f   :  { %2382 = vrot.lane.b32.xlu0 %v2380_v28, %s7574_s23 }
 0x811   :  { %v2383_v35 = vpop.permute.xlu0 %2382 }
 0x812   :  { %v8018_v36 = vadd.f32 %v2383_v35, %v2375_v21 }
 0x814   :  { %7528 = vtanh.f32 %v8018_v36 }
 0x81e   :  { %v7529_v3 = vpop.eup %7528 }
 0x81f   :  { %2388 = vrot.lane.b32.xlu1 %v7529_v3, %s7573_s5 }
 0x891   :  { %v2389_v26 = vpop.permute.xlu1 %2388 }
 0x892   :  { %v2391_v29 = vmul.f32 %v7527_v33, %v2389_v26 }
 0x894   :  { %2393 = vrot.lane.b32.xlu0 %v2391_v29, %s7574_s23 }
 0x906   :  { %v2394_v34 = vpop.permute.xlu0 %2393 }
 0x907   :  { %v2395_v37 = vsel %vm844_vm1, %v2394_v34, 0 }
 0x908   :  { %v8024_v39 = vand.u32 4294901760, %v2395_v37 }
 0x90a   :  { %v8027_v38 = vsub.f32 %v2395_v37, %v8024_v39 }
 0x90c   :  { %v8030_v42 = vand.u32 4294901760, %v8027_v38 }
 0x90e   :  { %v2469_v51 = vsub.f32 %v8027_v38, %v8030_v42 }
 0x910   :  { %v8034_v53 = vand.u32 4294901760, %v2469_v51 }
 0x912   :  { %6524 = vmatmul.mubr.f32.vlgmr.msra.gmra.mrb[12].mxu1 %v8034_v53 }
 0x913   :  { %7105 = vmatpush3.bf16.msra.mxu1 %v7813_v41  ;;  %6534 = vmatprep.mubr.msk.f32.mxu1 %vm7571_vm2, %v7572_v40 }
 0x914   :  { %7106 = vmatprep.subr.bf16.mxu1 %v7570_v8 }
 0x917   :  { %7108 = vmatpush3.bf16.msra.mxu1 %v7816_v44 }
 0x918   :  { %7109 = vmatprep.subr.bf16.mxu1 %v7570_v8 }
 0x91a   :  { %6535 = vmatmul.mubr.f32.vlgmr.msra.gmra.mrb[12].mxu1 %v8024_v39 }
 0x91b   :  { %7111 = vmatpush3.bf16.msra.mxu1 %v7824_v45  ;;  %6545 = vmatprep.mubr.msk.f32.mxu1 %vm7571_vm2, %v7572_v40 }
 0x91c   :  { %7112 = vmatprep.subr.bf16.mxu1 %v7570_v8 }
 0x91f   :  { %7114 = vmatpush3.bf16.msra.mxu1 %v7829_v46 }
 0x920   :  { %7115 = vmatprep.subr.bf16.mxu1 %v7570_v8 }
 0x922   :  { %6546 = vmatmul.mubr.f32.vlgmr.msra.gmra.mrb[12].mxu1 %v8027_v38 }
 0x923   :  { %7117 = vmatpush3.bf16.msra.mxu1 %v7770_v27  ;;  %6556 = vmatprep.mubr.msk.f32.mxu1 %vm7571_vm2, %v7572_v40 }
 0x924   :  { %7118 = vmatprep.subr.bf16.mxu1 %v7570_v8 }
 0x927   :  { %7120 = vmatpush3.bf16.msra.mxu1 %v7780_v9 }
 0x928   :  { %7121 = vmatprep.subr.bf16.mxu1 %v7570_v8 }
 0x92a   :  { %6557 = vmatmul.mubr.f32.vlgmr.msra.gmra.mrb[12].mxu1 %v8030_v42 }
 0x92b   :  { %7123 = vmatpush3.bf16.msra.mxu1 %v7842_v47  ;;  %6567 = vmatprep.mubr.msk.f32.mxu1 %vm7571_vm2, %v7572_v40 }
 0x92c   :  { %7124 = vmatprep.subr.bf16.mxu1 %v7570_v8 }
 0x92f   :  { %7126 = vmatpush3.bf16.msra.mxu1 %v7846_v48 }
 0x930   :  { %7127 = vmatprep.subr.bf16.mxu1 %v7570_v8 }
 0x932   :  { %6568 = vmatmul.mubr.f32.vlgmr.msra.gmra.mrb[12].mxu1 %v8024_v39 }
 0x933   :  { %7129 = vmatpush3.bf16.msra.mxu1 %v7770_v27  ;;  %6578 = vmatprep.mubr.msk.f32.mxu1 %vm7571_vm2, %v7572_v40 }
 0x934   :  { %7130 = vmatprep.subr.bf16.mxu1 %v7570_v8 }
 0x937   :  { %7132 = vmatpush3.bf16.msra.mxu1 %v7780_v9 }
 0x938   :  { %7169 = vmatprep.subr.bf16.mxu1 %v7570_v8 }
 0x93a   :  { %6579 = vmatmul.mubr.f32.vlgmr.msra.gmra.mrb[12].mxu1 %v8024_v39 }
 0x93b   :  { %7171 = vmatpush3.bf16.msra.mxu1 %v7770_v27  ;;  %6655 = vmatprep.mubr.msk.f32.mxu1 %vm7571_vm2, %v7572_v40 }
 0x93c   :  { %7172 = vmatprep.subr.bf16.mxu1 %v7570_v8 }
 0x93f   :  { %7174 = vmatpush3.bf16.msra.mxu1 %v7780_v9 }
 0x940   :  { %7175 = vmatprep.subr.bf16.mxu1 %v7570_v8 }
 0xa0d   :  { %v2878_v54 = vpop.f32.mrb[12].mxu1 }
 0xa0e   :  { %v2882_v55 = vadd.f32 %v7872_v1, %v2878_v54  ;;  %v6580_v56 = vpop.f32.mrb[13].mxu1 }
 0xa10   :  { %7530 = vtanh.f32 %v2882_v55  ;;  %v5842_v59 = vmul.f32 -1.442695, %v2882_v55 }
 0xa12   :  { %7532 = vpow2.f32 %v5842_v59 }
 0xa1a   :  { %v7531_v58 = vpop.eup %7530 }
 0xa1b   :  { %2892 = vrot.lane.b32.xlu1 %v7531_v58, %s7573_s5 }
 0xa1c   :  { %v7533_v60 = vpop.eup %7532 }
 0xa1d   :  { %v2886_v61 = vadd.f32 1.0, %v7533_v60 }
 0xa1f   :  { %7534 = vrcp.f32 %v2886_v61 }
 0xa29   :  { %v7535_v62 = vpop.eup %7534 }
 0xa2a   :  { %v2890_v2 = vmul.f32 %v7535_v62, %v8018_v36 }
 0xa8d   :  { %v2893_v63 = vpop.permute.xlu1 %2892 }
 0xa8e   :  { %v2895_v0 = vmul.f32 %v7535_v62, %v2893_v63 }
 0xa90   :  { %2897 = vrot.lane.b32.xlu0 %v2895_v0, %s7574_s23 }
 0xb02   :  { %v2898_v4 = vpop.permute.xlu0 %2897 }
 0xb03   :  { %v8082_v57 = vadd.f32 %v2898_v4, %v2890_v2 }
 0xb05   :  { %7536 = vtanh.f32 %v8082_v57 }
 0xb0f   :  { %v7537_v1 = vpop.eup %7536 }
 0xb10   :  { %2903 = vrot.lane.b32.xlu1 %v7537_v1, %s7573_s5 }
 0xb82   :  { %v2904_v5 = vpop.permute.xlu1 %2903 }
 0xb83   :  { %v2906_v6 = vmul.f32 %v7535_v62, %v2904_v5 }
 0xb85   :  { %2908 = vrot.lane.b32.xlu0 %v2906_v6, %s7574_s23 }
 0xbf7   :  { %v2909_v7 = vpop.permute.xlu0 %2908 }
 0xbf8   :  { %v2910_v10 = vsel %vm844_vm1, %v2909_v7, 0 }
 0xbf9   :  { %v8088_v17 = vand.u32 4294901760, %v2910_v10 }
 0xbfb   :  { %v8091_v25 = vsub.f32 %v2910_v10, %v8088_v17 }
 0xbfd   :  { %v8094_v30 = vand.u32 4294901760, %v8091_v25 }
 0xbff   :  { %v2984_v31 = vsub.f32 %v8091_v25, %v8094_v30 }
 0xc01   :  { %v8098_v32 = vand.u32 4294901760, %v2984_v31 }
 0xc03   :  { %6590 = vmatmul.mubr.f32.vlgmr.msra.gmra.mrb[10].mxu0 %v8098_v32 }
 0xc04   :  { %7141 = vmatpush3.bf16.msra.mxu0 %v7813_v41  ;;  %6600 = vmatprep.mubr.msk.f32.mxu0 %vm7571_vm2, %v7572_v40 }
 0xc05   :  { %7142 = vmatprep.subr.bf16.mxu0 %v7570_v8 }
 0xc08   :  { %7144 = vmatpush3.bf16.msra.mxu0 %v7816_v44 }
 0xc09   :  { %7145 = vmatprep.subr.bf16.mxu0 %v7570_v8 }
 0xc0b   :  { %6601 = vmatmul.mubr.f32.vlgmr.msra.gmra.mrb[10].mxu0 %v8088_v17 }
 0xc0c   :  { %7147 = vmatpush3.bf16.msra.mxu0 %v7824_v45  ;;  %6611 = vmatprep.mubr.msk.f32.mxu0 %vm7571_vm2, %v7572_v40 }
 0xc0d   :  { %7148 = vmatprep.subr.bf16.mxu0 %v7570_v8 }
 0xc10   :  { %7150 = vmatpush3.bf16.msra.mxu0 %v7829_v46 }
 0xc11   :  { %7151 = vmatprep.subr.bf16.mxu0 %v7570_v8 }
 0xc13   :  { %6612 = vmatmul.mubr.f32.vlgmr.msra.gmra.mrb[10].mxu0 %v8091_v25 }
 0xc14   :  { %7153 = vmatpush3.bf16.msra.mxu0 %v7770_v27  ;;  %6622 = vmatprep.mubr.msk.f32.mxu0 %vm7571_vm2, %v7572_v40 }
 0xc15   :  { %7154 = vmatprep.subr.bf16.mxu0 %v7570_v8 }
 0xc18   :  { %7156 = vmatpush3.bf16.msra.mxu0 %v7780_v9 }
 0xc19   :  { %7157 = vmatprep.subr.bf16.mxu0 %v7570_v8 }
 0xc1b   :  { %6623 = vmatmul.mubr.f32.vlgmr.msra.gmra.mrb[10].mxu0 %v8094_v30 }
 0xc1c   :  { %7159 = vmatpush3.bf16.msra.mxu0 %v7842_v47  ;;  %6633 = vmatprep.mubr.msk.f32.mxu0 %vm7571_vm2, %v7572_v40 }
 0xc1d   :  { %7160 = vmatprep.subr.bf16.mxu0 %v7570_v8 }
 0xc20   :  { %7162 = vmatpush3.bf16.msra.mxu0 %v7846_v48 }
 0xc21   :  { %7163 = vmatprep.subr.bf16.mxu0 %v7570_v8 }
 0xc23   :  { %6634 = vmatmul.mubr.f32.vlgmr.msra.gmra.mrb[10].mxu0 %v8088_v17 }
 0xc24   :  { %7165 = vmatpush3.bf16.msra.mxu0 %v7770_v27  ;;  %6644 = vmatprep.mubr.msk.f32.mxu0 %vm7571_vm2, %v7572_v40 }
 0xc25   :  { %7166 = vmatprep.subr.bf16.mxu0 %v7570_v8 }
 0xc28   :  { %7168 = vmatpush3.bf16.msra.mxu0 %v7780_v9 }
 0xc29   :  { %7205 = vmatprep.subr.bf16.mxu0 %v7570_v8 }
 0xc2b   :  { %6645 = vmatmul.mubr.f32.vlgmr.msra.gmra.mrb[10].mxu0 %v8088_v17 }
 0xc2c   :  { %7207 = vmatpush3.bf16.msra.mxu0 %v7770_v27  ;;  %6721 = vmatprep.mubr.msk.f32.mxu0 %vm7571_vm2, %v7572_v40 }
 0xc2d   :  { %7208 = vmatprep.subr.bf16.mxu0 %v7570_v8 }
 0xc30   :  { %7210 = vmatpush3.bf16.msra.mxu0 %v7780_v9 }
 0xc31   :  { %7211 = vmatprep.subr.bf16.mxu0 %v7570_v8 }
 0xcfe   :  { %v3393_v19 = vpop.f32.mrb[10].mxu0 }
 0xcff   :  { %v3397_v15 = vadd.f32 %v7878_v13, %v3393_v19  ;;  %v6646_v20 = vpop.f32.mrb[11].mxu0 }
 0xd01   :  { %7538 = vtanh.f32 %v3397_v15  ;;  %v5843_v23 = vmul.f32 -1.442695, %v3397_v15 }
 0xd03   :  { %7540 = vpow2.f32 %v5843_v23 }
 0xd0b   :  { %v7539_v33 = vpop.eup %7538 }
 0xd0c   :  { %3407 = vrot.lane.b32.xlu1 %v7539_v33, %s7573_s5 }
 0xd0d   :  { %v7541_v28 = vpop.eup %7540 }
 0xd0e   :  { %v3401_v21 = vadd.f32 1.0, %v7541_v28 }
 0xd10   :  { %7542 = vrcp.f32 %v3401_v21 }
 0xd1a   :  { %v7543_v35 = vpop.eup %7542 }
 0xd1b   :  { %v3405_v26 = vmul.f32 %v7543_v35, %v8082_v57 }
 0xd7e   :  { %v3408_v36 = vpop.permute.xlu1 %3407 }
 0xd7f   :  { %v3410_v3 = vmul.f32 %v7543_v35, %v3408_v36 }
 0xd81   :  { %3412 = vrot.lane.b32.xlu0 %v3410_v3, %s7574_s23 }
 0xdf3   :  { %v3413_v29 = vpop.permute.xlu0 %3412 }
 0xdf4   :  { %v8146_v34 = vadd.f32 %v3413_v29, %v3405_v26  ;;  %v8254_v26 = vld [vmem:[%s8464_s6] sm:$0xff]  ;;  %v8259_v29 = vld [vmem:[%s8464_s6 + $0x8] sm:$0xff] }
 0xdf6   :  { %7544 = vtanh.f32 %v8146_v34 }
 0xe00   :  { %v7545_v13 = vpop.eup %7544 }
 0xe01   :  { %3418 = vrot.lane.b32.xlu1 %v7545_v13, %s7573_s5  ;;  %v4987_v13 = vand.u32 4294901760, %v8259_v29 }
 0xe73   :  { %v3419_v37 = vpop.permute.xlu1 %3418 }
 0xe74   :  { %v3421_v51 = vmul.f32 %v7543_v35, %v3419_v37  ;;  %v8268_v37 = vld [vmem:[%s8464_s6 + $0x10] sm:$0xff] }
 0xe76   :  { %3423 = vrot.lane.b32.xlu0 %v3421_v51, %s7574_s23  ;;  %v8273_v51 = vld [vmem:[%s8464_s6 + $0x18] sm:$0xff] }
 0xee8   :  { %v3424_v54 = vpop.permute.xlu0 %3423 }
 0xee9   :  { %v3425_v55 = vsel %vm844_vm1, %v3424_v54, 0 }
 0xeea   :  { %v8152_v56 = vand.u32 4294901760, %v3425_v55 }
 0xeec   :  { %v8155_v58 = vsub.f32 %v3425_v55, %v8152_v56  ;;  %v4990_v55 = vand.u32 4294901760, %v8268_v37 }
 0xeee   :  { %v8158_v59 = vand.u32 4294901760, %v8155_v58 }
 0xef0   :  { %v3499_v60 = vsub.f32 %v8155_v58, %v8158_v59 }
 0xef2   :  { %v8162_v61 = vand.u32 4294901760, %v3499_v60  ;;  %v4993_v60 = vand.u32 4294901760, %v8273_v51 }
 0xef4   :  { %6656 = vmatmul.mubr.f32.vlgmr.msra.gmra.mrb[14].mxu1 %v8162_v61 }
 0xef5   :  { %7177 = vmatpush3.bf16.msra.mxu1 %v7813_v41  ;;  %6666 = vmatprep.mubr.msk.f32.mxu1 %vm7571_vm2, %v7572_v40 }
 0xef6   :  { %7178 = vmatprep.subr.bf16.mxu1 %v7570_v8 }
 0xef9   :  { %7180 = vmatpush3.bf16.msra.mxu1 %v7816_v44 }
 0xefa   :  { %7181 = vmatprep.subr.bf16.mxu1 %v7570_v8 }
 0xefc   :  { %6667 = vmatmul.mubr.f32.vlgmr.msra.gmra.mrb[14].mxu1 %v8152_v56 }
 0xefd   :  { %7183 = vmatpush3.bf16.msra.mxu1 %v7824_v45  ;;  %6677 = vmatprep.mubr.msk.f32.mxu1 %vm7571_vm2, %v7572_v40 }
 0xefe   :  { %7184 = vmatprep.subr.bf16.mxu1 %v7570_v8 }
 0xf01   :  { %7186 = vmatpush3.bf16.msra.mxu1 %v7829_v46 }
 0xf02   :  { %7187 = vmatprep.subr.bf16.mxu1 %v7570_v8 }
 0xf04   :  { %6678 = vmatmul.mubr.f32.vlgmr.msra.gmra.mrb[14].mxu1 %v8155_v58 }
 0xf05   :  { %7189 = vmatpush3.bf16.msra.mxu1 %v7770_v27  ;;  %6688 = vmatprep.mubr.msk.f32.mxu1 %vm7571_vm2, %v7572_v40 }
 0xf06   :  { %7190 = vmatprep.subr.bf16.mxu1 %v7570_v8 }
 0xf09   :  { %7192 = vmatpush3.bf16.msra.mxu1 %v7780_v9 }
 0xf0a   :  { %7193 = vmatprep.subr.bf16.mxu1 %v7570_v8 }
 0xf0c   :  { %6689 = vmatmul.mubr.f32.vlgmr.msra.gmra.mrb[14].mxu1 %v8158_v59 }
 0xf0d   :  { %7195 = vmatpush3.bf16.msra.mxu1 %v7842_v47  ;;  %6699 = vmatprep.mubr.msk.f32.mxu1 %vm7571_vm2, %v7572_v40 }
 0xf0e   :  { %7196 = vmatprep.subr.bf16.mxu1 %v7570_v8 }
 0xf11   :  { %7198 = vmatpush3.bf16.msra.mxu1 %v7846_v48 }
 0xf12   :  { %7199 = vmatprep.subr.bf16.mxu1 %v7570_v8 }
 0xf14   :  { %6700 = vmatmul.mubr.f32.vlgmr.msra.gmra.mrb[14].mxu1 %v8152_v56 }
 0xf15   :  { %7201 = vmatpush3.bf16.msra.mxu1 %v7770_v27  ;;  %6710 = vmatprep.mubr.msk.f32.mxu1 %vm7571_vm2, %v7572_v40 }
 0xf16   :  { %7202 = vmatprep.subr.bf16.mxu1 %v7570_v8 }
 0xf19   :  { %7204 = vmatpush3.bf16.msra.mxu1 %v7780_v9 }
 0xf1a   :  { %7241 = vmatprep.subr.bf16.mxu1 %v7570_v8 }
 0xf1c   :  { %6711 = vmatmul.mubr.f32.vlgmr.msra.gmra.mrb[14].mxu1 %v8152_v56 }
 0xf1d   :  { %7243 = vmatpush3.bf16.msra.mxu1 %v7770_v27  ;;  %6787 = vmatprep.mubr.msk.f32.mxu1 %vm7571_vm2, %v7572_v40 }
 0xf1e   :  { %7244 = vmatprep.subr.bf16.mxu1 %v7570_v8 }
 0xf21   :  { %7246 = vmatpush3.bf16.msra.mxu1 %v7780_v9 }
 0xf22   :  { %7247 = vmatprep.subr.bf16.mxu1 %v7570_v8 }
 0xfef   :  { %v3908_v62 = vpop.f32.mrb[14].mxu1 }
 0xff0   :  { %v3912_v63 = vadd.f32 %v7876_v11, %v3908_v62  ;;  %v6712_v0 = vpop.f32.mrb[15].mxu1  ;;  %v8294_v62 = vpack.c.bf16 %v4993_v60, %v4990_v55 }
 0xff2   :  { %7546 = vtanh.f32 %v3912_v63  ;;  %v5844_v4 = vmul.f32 -1.442695, %v3912_v63 }
 0xff4   :  { %7548 = vpow2.f32 %v5844_v4 }
 0xffc   :  { %v7547_v2 = vpop.eup %7546 }
 0xffd   :  { %3922 = vrot.lane.b32.xlu1 %v7547_v2, %s7573_s5 }
 0xffe   :  { %v7549_v57 = vpop.eup %7548 }
 0xfff   :  { %v3916_v1 = vadd.f32 1.0, %v7549_v57 }
0x1001   :  { %7550 = vrcp.f32 %v3916_v1 }
0x100b   :  { %v7551_v5 = vpop.eup %7550 }
0x100c   :  { %v3920_v10 = vmul.f32 %v7551_v5, %v8146_v34  ;;  %v4984_v34 = vand.u32 4294901760, %v8254_v26 }
0x100e   :  { %v8284_v54 = vpack.c.bf16 %v4987_v13, %v4984_v34 }
0x106f   :  { %v3923_v6 = vpop.permute.xlu1 %3922 }
0x1070   :  { %v3925_v7 = vmul.f32 %v7551_v5, %v3923_v6 }
0x1072   :  { %3927 = vrot.lane.b32.xlu0 %v3925_v7, %s7574_s23 }
0x10e4   :  { %v3928_v31 = vpop.permute.xlu0 %3927 }
0x10e5   :  { %v8210_v19 = vadd.f32 %v3928_v31, %v3920_v10 }
0x10e7   :  { %7552 = vtanh.f32 %v8210_v19 }
0x10f1   :  { %v7553_v11 = vpop.eup %7552 }
0x10f2   :  { %3933 = vrot.lane.b32.xlu1 %v7553_v11, %s7573_s5 }
0x1164   :  { %v3934_v15 = vpop.permute.xlu1 %3933 }
0x1165   :  { %v3936_v20 = vmul.f32 %v7551_v5, %v3934_v15 }
0x1167   :  { %3938 = vrot.lane.b32.xlu0 %v3936_v20, %s7574_s23 }
0x11d9   :  { %v3939_v33 = vpop.permute.xlu0 %3938 }
0x11da   :  { %v3940_v23 = vsel %vm844_vm1, %v3939_v33, 0 }
0x11db   :  { %v8216_v28 = vand.u32 4294901760, %v3940_v23 }
0x11dd   :  { %v8219_v21 = vsub.f32 %v3940_v23, %v8216_v28 }
0x11df   :  { %v8222_v35 = vand.u32 4294901760, %v8219_v21 }
0x11e1   :  { %v4014_v36 = vsub.f32 %v8219_v21, %v8222_v35 }
0x11e3   :  { %v4015_v3 = vand.u32 4294901760, %v4014_v36 }
0x11e5   :  { %6722 = vmatmul.mubr.f32.vlgmr.msra.gmra.mrb[12].mxu0 %v4015_v3 }
0x11e6   :  { %7213 = vmatpush3.bf16.msra.mxu0 %v7813_v41  ;;  %6732 = vmatprep.mubr.msk.f32.mxu0 %vm7571_vm2, %v7572_v40 }
0x11e7   :  { %7214 = vmatprep.subr.bf16.mxu0 %v7570_v8 }
0x11ea   :  { %7216 = vmatpush3.bf16.msra.mxu0 %v7816_v44 }
0x11eb   :  { %7217 = vmatprep.subr.bf16.mxu0 %v7570_v8 }
0x11ed   :  { %6733 = vmatmul.mubr.f32.vlgmr.msra.gmra.mrb[12].mxu0 %v8216_v28 }
0x11ee   :  { %7219 = vmatpush3.bf16.msra.mxu0 %v7824_v45  ;;  %6743 = vmatprep.mubr.msk.f32.mxu0 %vm7571_vm2, %v7572_v40 }
0x11ef   :  { %7220 = vmatprep.subr.bf16.mxu0 %v7570_v8 }
0x11f2   :  { %7222 = vmatpush3.bf16.msra.mxu0 %v7829_v46 }
0x11f3   :  { %7223 = vmatprep.subr.bf16.mxu0 %v7570_v8 }
0x11f5   :  { %6744 = vmatmul.mubr.f32.vlgmr.msra.gmra.mrb[12].mxu0 %v8219_v21 }
0x11f6   :  { %7225 = vmatpush3.bf16.msra.mxu0 %v7770_v27  ;;  %6754 = vmatprep.mubr.msk.f32.mxu0 %vm7571_vm2, %v7572_v40 }
0x11f7   :  { %7226 = vmatprep.subr.bf16.mxu0 %v7570_v8 }
0x11fa   :  { %7228 = vmatpush3.bf16.msra.mxu0 %v7780_v9 }
0x11fb   :  { %7229 = vmatprep.subr.bf16.mxu0 %v7570_v8 }
0x11fd   :  { %6755 = vmatmul.mubr.f32.vlgmr.msra.gmra.mrb[12].mxu0 %v8222_v35 }
0x11fe   :  { %7231 = vmatpush3.bf16.msra.mxu0 %v7842_v47  ;;  %6765 = vmatprep.mubr.msk.f32.mxu0 %vm7571_vm2, %v7572_v40 }
0x11ff   :  { %7232 = vmatprep.subr.bf16.mxu0 %v7570_v8 }
0x1202   :  { %7234 = vmatpush3.bf16.msra.mxu0 %v7846_v48 }
0x1203   :  { %7235 = vmatprep.subr.bf16.mxu0 %v7570_v8 }
0x1205   :  { %6766 = vmatmul.mubr.f32.vlgmr.msra.gmra.mrb[12].mxu0 %v8216_v28 }
0x1206   :  { %7237 = vmatpush3.bf16.msra.mxu0 %v7770_v27  ;;  %6776 = vmatprep.mubr.msk.f32.mxu0 %vm7571_vm2, %v7572_v40 }
0x1207   :  { %7238 = vmatprep.subr.bf16.mxu0 %v7570_v8 }
0x120a   :  { %7240 = vmatpush3.bf16.msra.mxu0 %v7780_v9 }
0x120b   :  { %7278 = vmatprep.subr.bf16.mxu0 %v8284_v54 }
0x120d   :  { %6777 = vmatmul.mubr.f32.vlgmr.msra.gmra.mrb[12].mxu0 %v8216_v28 }
0x120e   :  { %7280 = vmatpush3.bf16.msra.mxu0 %v8284_v54  ;;  %6853 = vmatprep.mubr.f32.mxu0 %v7906_v52 }
0x120f   :  { %7282 = vmatprep.subr.bf16.mxu0 %v8294_v62 }
0x1212   :  { %7284 = vmatpush3.bf16.msra.mxu0 %v8294_v62 }
0x1215   :  { %6854 = vmatmul.mubr.f32.vlgmr.msra.gmra.mrb[14].mxu0 %v7970_v18 }
0x1216   :  { %6856 = vmatprep.mubr.f32.mxu0 %v8034_v53 }
0x1219   :  { %6857 = vmatmul.mubr.f32.gmra.mrb[16].mxu0 %v8098_v32 }
0x121a   :  { %6859 = vmatprep.mubr.f32.mxu0 %v8162_v61 }
0x121d   :  { %6860 = vmatmul.mubr.f32.gmra.mrb[18].mxu0 %v4015_v3 }
0x12e0   :  { %v4423_v63 = vpop.f32.mrb[12].mxu0 }
0x12e1   :  { %v4427_v0 = vadd.f32 %v7882_v24, %v4423_v63  ;;  %v6778_v2 = vpop.f32.mrb[13].mxu0 }
0x12e3   :  { %7554 = vtanh.f32 %v4427_v0  ;;  %v5845_v52 = vmul.f32 -1.442695, %v4427_v0  ;;  %v5141_v0 = vsub.f32 %v8259_v29, %v4987_v13  ;;  %v5155_v29 = vsub.f32 %v8273_v51, %v4993_v60 }
0x12e5   :  { %7556 = vpow2.f32 %v5845_v52  ;;  %v5156_v13 = vand.u32 4294901760, %v5155_v29 }
0x12ed   :  { %v7555_v4 = vpop.eup %7554 }
0x12ee   :  { %4437 = vrot.lane.b32.xlu1 %v7555_v4, %s7573_s5  ;;  %v5142_v4 = vand.u32 4294901760, %v5141_v0 }
0x12ef   :  { %v7557_v57 = vpop.eup %7556 }
0x12f0   :  { %v4431_v1 = vadd.f32 1.0, %v7557_v57  ;;  %v5143_v57 = vsub.f32 %v5141_v0, %v5142_v4 }
0x12f2   :  { %7558 = vrcp.f32 %v4431_v1 }
0x12fc   :  { %v7559_v18 = vpop.eup %7558 }
0x12fd   :  { %v4435_v32 = vmul.f32 %v7559_v18, %v8210_v19 }
0x1360   :  { %v4438_v53 = vpop.permute.xlu1 %4437 }
0x1361   :  { %v4440_v5 = vmul.f32 %v7559_v18, %v4438_v53 }
0x1363   :  { %4442 = vrot.lane.b32.xlu0 %v4440_v5, %s7574_s23 }
0x13d5   :  { %v4443_v61 = vpop.permute.xlu0 %4442 }
0x13d6   :  { %v4445_v6 = vadd.f32 %v4443_v61, %v4435_v32  ;;  %v5157_v61 = vsub.f32 %v5155_v29, %v5156_v13 }
0x13d8   :  { %7560 = vtanh.f32 %v4445_v6 }
0x13e2   :  { %v7561_v24 = vpop.eup %7560 }
0x13e3   :  { %4448 = vrot.lane.b32.xlu1 %v7561_v24, %s7573_s5  ;;  %v5158_v24 = vand.u32 4294901760, %v5157_v61 }
0x1455   :  { %v4449_v7 = vpop.permute.xlu1 %4448 }
0x1456   :  { %v4451_v10 = vmul.f32 %v7559_v18, %v4449_v7  ;;  %v5144_v18 = vand.u32 4294901760, %v5143_v57 }
0x1458   :  { %4453 = vrot.lane.b32.xlu0 %v4451_v10, %s7574_s23 }
0x14ca   :  { %v4454_v31 = vpop.permute.xlu0 %4453 }
0x14cb   :  { %v4455_v11 = vsel %vm844_vm1, %v4454_v31, 0 }
0x14cc   :  { %v8312_v15 = vand.u32 4294901760, %v4455_v11 }
0x14ce   :  { %v8315_v20 = vsub.f32 %v4455_v11, %v8312_v15 }
0x14d0   :  { %v8318_v19 = vand.u32 4294901760, %v8315_v20 }
0x14d2   :  { %v4529_v33 = vsub.f32 %v8315_v20, %v8318_v19 }
0x14d4   :  { %v4530_v23 = vand.u32 4294901760, %v4529_v33 }
0x14d6   :  { %6788 = vmatmul.mubr.f32.vlgmr.msra.gmra.mrb[16].mxu1 %v4530_v23  ;;  %6862 = vmatprep.mubr.f32.mxu0 %v4530_v23 }
0x14d7   :  { %7249 = vmatpush3.bf16.msra.mxu1 %v7813_v41  ;;  %6798 = vmatprep.mubr.msk.f32.mxu1 %vm7571_vm2, %v7572_v40 }
0x14d8   :  { %7250 = vmatprep.subr.bf16.mxu1 %v7570_v8 }
0x14db   :  { %7252 = vmatpush3.bf16.msra.mxu1 %v7816_v44 }
0x14dc   :  { %7253 = vmatprep.subr.bf16.mxu1 %v7570_v8 }
0x14de   :  { %6799 = vmatmul.mubr.f32.vlgmr.msra.gmra.mrb[16].mxu1 %v8312_v15 }
0x14df   :  { %7255 = vmatpush3.bf16.msra.mxu1 %v7824_v45  ;;  %6809 = vmatprep.mubr.msk.f32.mxu1 %vm7571_vm2, %v7572_v40 }
0x14e0   :  { %7256 = vmatprep.subr.bf16.mxu1 %v7570_v8 }
0x14e3   :  { %7258 = vmatpush3.bf16.msra.mxu1 %v7829_v46 }
0x14e4   :  { %7259 = vmatprep.subr.bf16.mxu1 %v7570_v8 }
0x14e6   :  { %6810 = vmatmul.mubr.f32.vlgmr.msra.gmra.mrb[16].mxu1 %v8315_v20 }
0x14e7   :  { %7261 = vmatpush3.bf16.msra.mxu1 %v7770_v27  ;;  %6820 = vmatprep.mubr.msk.f32.mxu1 %vm7571_vm2, %v7572_v40 }
0x14e8   :  { %7262 = vmatprep.subr.bf16.mxu1 %v7570_v8 }
0x14eb   :  { %7264 = vmatpush3.bf16.msra.mxu1 %v7780_v9 }
0x14ec   :  { %7265 = vmatprep.subr.bf16.mxu1 %v7570_v8 }
0x14ee   :  { %6821 = vmatmul.mubr.f32.vlgmr.msra.gmra.mrb[16].mxu1 %v8318_v19 }
0x14ef   :  { %7267 = vmatpush3.bf16.msra.mxu1 %v7842_v47  ;;  %6831 = vmatprep.mubr.msk.f32.mxu1 %vm7571_vm2, %v7572_v40 }
0x14f0   :  { %7268 = vmatprep.subr.bf16.mxu1 %v7570_v8 }
0x14f3   :  { %7270 = vmatpush3.bf16.msra.mxu1 %v7846_v48 }
0x14f4   :  { %7271 = vmatprep.subr.bf16.mxu1 %v7570_v8 }
0x14f6   :  { %6832 = vmatmul.mubr.f32.vlgmr.msra.gmra.mrb[16].mxu1 %v8312_v15 }
0x14f7   :  { %7273 = vmatpush3.bf16.msra.mxu1 %v7770_v27  ;;  %6842 = vmatprep.mubr.msk.f32.mxu1 %vm7571_vm2, %v7572_v40 }
0x14f8   :  { %7274 = vmatprep.subr.bf16.mxu1 %v7570_v8 }
0x14fb   :  { %7276 = vmatpush3.bf16.msra.mxu1 %v7780_v9 }
0x14fe   :  { %6843 = vmatmul.mubr.f32.vlgmr.msra.gmra.mrb[16].mxu1 %v8312_v15 }
0x15d1   :  { %v4938_v41 = vpop.f32.mrb[16].mxu1 }
0x15d2   :  { %v4942_v44 = vadd.f32 %v7880_v22, %v4938_v41  ;;  %v6844_v45 = vpop.f32.mrb[17].mxu1  ;;  %v5134_v22 = vsub.f32 %v8254_v26, %v4984_v34  ;;  %v5148_v26 = vsub.f32 %v8268_v37, %v4990_v55 }
0x15d4   :  { %7562 = vtanh.f32 %v4942_v44  ;;  %v5846_v47 = vmul.f32 -1.442695, %v4942_v44  ;;  %v5135_v2 = vand.u32 4294901760, %v5134_v22  ;;  %v5149_v34 = vand.u32 4294901760, %v5148_v26 }
0x15d5   :  { %v7293_v11 = vpack.c.bf16 %v5141_v0, %v5134_v22  ;;  %v7297_v37 = vpack.c.bf16 %v5155_v29, %v5148_v26 }
0x15d6   :  { %7564 = vpow2.f32 %v5846_v47  ;;  %v5136_v52 = vsub.f32 %v5134_v22, %v5135_v2  ;;  %v5150_v32 = vsub.f32 %v5148_v26, %v5149_v34  ;;  %v7313_v55 = vpack.c.bf16 %v5156_v13, %v5149_v34 }
0x15d7   :  { %v5817_v26 = vstv %s8467_s9 }
0x15d8   :  { %v5137_v1 = vand.u32 4294901760, %v5136_v52 }
0x15da   :  { %v7285_v53 = vpack.c.bf16 %v5144_v18, %v5137_v1 }
0x15dc   :  { %7286 = vmatprep.subr.bf16.mxu0 %v7285_v53 }
0x15dd   :  { %7288 = vmatpush3.bf16.msra.mxu0 %v7285_v53 }
0x15de   :  { %v7563_v46 = vpop.eup %7562 }
0x15df   :  { %4952 = vrot.lane.b32.xlu1 %v7563_v46, %s7573_s5  ;;  %v7309_v46 = vpack.c.bf16 %v5142_v4, %v5135_v2 }
0x15e0   :  { %v7565_v27 = vpop.eup %7564 }
0x15e1   :  { %v4946_v48 = vadd.f32 1.0, %v7565_v27 }
0x15e3   :  { %7566 = vrcp.f32 %v4946_v48 }
0x15ed   :  { %v7567_v40 = vpop.eup %7566 }
0x15ee   :  { %v4950_v9 = vmul.f32 %v7567_v40, %v4445_v6  ;;  %v5151_v6 = vand.u32 4294901760, %v5150_v32 }
0x15f0   :  { %v7289_v10 = vpack.c.bf16 %v5158_v24, %v5151_v6 }
0x15f2   :  { %7290 = vmatprep.subr.bf16.mxu0 %v7289_v10 }
0x15f3   :  { %7292 = vmatpush3.bf16.msra.mxu0 %v7289_v10 }
0x15f4   :  { %7294 = vmatprep.subr.bf16.mxu0 %v7293_v11 }
0x1651   :  { %v4953_v36 = vpop.permute.xlu1 %4952 }
0x1652   :  { %v4955_v8 = vmul.f32 %v7567_v40, %v4953_v36 }
0x1654   :  { %4957 = vrot.lane.b32.xlu0 %v4955_v8, %s7574_s23 }
0x16c6   :  { %v4958_v3 = vpop.permute.xlu0 %4957 }
0x16c7   :  { %v4960_v63 = vadd.f32 %v4958_v3, %v4950_v9 }
0x16c9   :  { %7568 = vtanh.f32 %v4960_v63 }
0x16d3   :  { %v7569_v5 = vpop.eup %7568 }
0x16d4   :  { %4963 = vrot.lane.b32.xlu1 %v7569_v5, %s7573_s5 }
0x1746   :  { %v4964_v7 = vpop.permute.xlu1 %4963 }
0x1747   :  { %v4966_v31 = vmul.f32 %v7567_v40, %v4964_v7 }
0x1749   :  { %4979 = vrot.lane.b32.xlu0 %v4966_v31, %s7574_s23 }
0x17bb   :  { %v4980_v33 = vpop.permute.xlu0 %4979 }
0x17bc   :  { %v4981_v51 = vsel %vm844_vm1, %v4980_v33, 0 }
0x17bd   :  { %v5122_v60 = vand.u32 4294901760, %v4981_v51 }
0x17bf   :  { %v5123_v23 = vsub.f32 %v4981_v51, %v5122_v60 }
0x17c1   :  { %v5124_v41 = vand.u32 4294901760, %v5123_v23 }
0x17c3   :  { %v5125_v44 = vsub.f32 %v5123_v23, %v5124_v41 }
0x17c5   :  { %v5126_v45 = vand.u32 4294901760, %v5125_v44 }
0x17c7   :  { %6863 = vmatmul.mubr.f32.gmra.mrb[20].mxu0 %v5126_v45 }
0x17c8   :  { %6873 = vmatprep.mubr.f32.mxu0 %v7896_v43 }
0x17cb   :  { %6874 = vmatmul.mubr.f32.vlgmr.msra.gmra.mrb[14].mxu0 %v7960_v12 }
0x17cc   :  { %6876 = vmatprep.mubr.f32.mxu0 %v8024_v39  ;;  %7296 = vmatpush3.bf16.msra.mxu0 %v7293_v11 }
0x17cd   :  { %7298 = vmatprep.subr.bf16.mxu0 %v7297_v37 }
0x17cf   :  { %6877 = vmatmul.mubr.f32.gmra.mrb[16].mxu0 %v8088_v17 }
0x17d0   :  { %6879 = vmatprep.mubr.f32.mxu0 %v8152_v56  ;;  %7300 = vmatpush3.bf16.msra.mxu0 %v7297_v37 }
0x17d1   :  { %7302 = vmatprep.subr.bf16.mxu0 %v8284_v54 }
0x17d3   :  { %6880 = vmatmul.mubr.f32.gmra.mrb[18].mxu0 %v8216_v28 }
0x17d4   :  { %6882 = vmatprep.mubr.f32.mxu0 %v8312_v15 }
0x17d7   :  { %6883 = vmatmul.mubr.f32.gmra.mrb[20].mxu0 %v5122_v60 }
0x17d8   :  { %6893 = vmatprep.mubr.f32.mxu0 %v7899_v49  ;;  %v5847_v49 = vld [vmem:[%s8465_s7] ss:$0 sm:$0xff] }
0x17db   :  { %6894 = vmatmul.mubr.f32.vlgmr.msra.gmra.mrb[14].mxu0 %v7963_v14 }
0x17dc   :  { %6896 = vmatprep.mubr.f32.mxu0 %v8027_v38  ;;  %7304 = vmatpush3.bf16.msra.mxu0 %v8284_v54 }
0x17dd   :  { %7306 = vmatprep.subr.bf16.mxu0 %v8294_v62 }
0x17df   :  { %6897 = vmatmul.mubr.f32.gmra.mrb[16].mxu0 %v8091_v25 }
0x17e0   :  { %6899 = vmatprep.mubr.f32.mxu0 %v8155_v58  ;;  %7308 = vmatpush3.bf16.msra.mxu0 %v8294_v62 }
0x17e1   :  { %7310 = vmatprep.subr.bf16.mxu0 %v7309_v46 }
0x17e3   :  { %6900 = vmatmul.mubr.f32.gmra.mrb[18].mxu0 %v8219_v21 }
0x17e4   :  { %6902 = vmatprep.mubr.f32.mxu0 %v8315_v20 }
0x17e7   :  { %6903 = vmatmul.mubr.f32.gmra.mrb[20].mxu0 %v5123_v23 }
0x17e8   :  { %6913 = vmatprep.mubr.f32.mxu0 %v7902_v50 }
0x17eb   :  { %6914 = vmatmul.mubr.f32.vlgmr.msra.gmra.mrb[14].mxu0 %v7966_v16 }
0x17ec   :  { %6916 = vmatprep.mubr.f32.mxu0 %v8030_v42  ;;  %7312 = vmatpush3.bf16.msra.mxu0 %v7309_v46 }
0x17ed   :  { %7314 = vmatprep.subr.bf16.mxu0 %v7313_v55 }
0x17ef   :  { %6917 = vmatmul.mubr.f32.gmra.mrb[16].mxu0 %v8094_v30 }
0x17f0   :  { %6919 = vmatprep.mubr.f32.mxu0 %v8158_v59  ;;  %7316 = vmatpush3.bf16.msra.mxu0 %v7313_v55 }
0x17f1   :  { %7318 = vmatprep.subr.bf16.mxu0 %v8284_v54 }
0x17f3   :  { %6920 = vmatmul.mubr.f32.gmra.mrb[18].mxu0 %v8222_v35 }
0x17f4   :  { %6922 = vmatprep.mubr.f32.mxu0 %v8318_v19 }
0x17f7   :  { %6923 = vmatmul.mubr.f32.gmra.mrb[20].mxu0 %v5124_v41 }
0x17f8   :  { %6933 = vmatprep.mubr.f32.mxu0 %v7896_v43 }
0x17fb   :  { %6934 = vmatmul.mubr.f32.vlgmr.msra.gmra.mrb[14].mxu0 %v7960_v12 }
0x17fc   :  { %6936 = vmatprep.mubr.f32.mxu0 %v8024_v39  ;;  %7320 = vmatpush3.bf16.msra.mxu0 %v8284_v54 }
0x17fd   :  { %7322 = vmatprep.subr.bf16.mxu0 %v8294_v62 }
0x17ff   :  { %6937 = vmatmul.mubr.f32.gmra.mrb[16].mxu0 %v8088_v17 }
0x1800   :  { %6939 = vmatprep.mubr.f32.mxu0 %v8152_v56  ;;  %7324 = vmatpush3.bf16.msra.mxu0 %v8294_v62 }
0x1803   :  { %6940 = vmatmul.mubr.f32.gmra.mrb[18].mxu0 %v8216_v28 }
0x1804   :  { %6942 = vmatprep.mubr.f32.mxu0 %v8312_v15 }
0x1807   :  { %6943 = vmatmul.mubr.f32.gmra.mrb[20].mxu0 %v5122_v60 }
0x1808   :  { %6953 = vmatprep.mubr.f32.mxu0 %v7896_v43 }
0x180b   :  { %6954 = vmatmul.mubr.f32.vlgmr.msra.gmra.mrb[14].mxu0 %v7960_v12  ;;  %v5848_v12 = vld [vmem:[%s8466_s8] ss:$0 sm:$0xff] }
0x180c   :  { %6956 = vmatprep.mubr.f32.mxu0 %v8024_v39 }
0x180f   :  { %6957 = vmatmul.mubr.f32.gmra.mrb[16].mxu0 %v8088_v17 }
0x1810   :  { %6959 = vmatprep.mubr.f32.mxu0 %v8152_v56 }
0x1813   :  { %6960 = vmatmul.mubr.f32.gmra.mrb[18].mxu0 %v8216_v28 }
0x1814   :  { %6962 = vmatprep.mubr.f32.mxu0 %v8312_v15 }
0x1817   :  { %6963 = vmatmul.mubr.f32.gmra.mrb[20].mxu0 %v5122_v60 }
0x18de   :  { %v6955_v50 = vpop.f32.mrb[14].mxu0 }
0x18df   :  { %v7341_v14 = vadd.f32 %v6955_v50, %v5847_v49  ;;  %v5723_v43 = vpop.f32.mrb[15].mxu0 }
0x18e0   :  { %v7342_v16 = vadd.f32 %v5847_v49, %v5723_v43 }
0x18e1   :  { %v5770_v39 = vmax.f32 %v7341_v14, 0.0 }
0x18e2   :  { %v5769_v38 = vmax.f32 %v7342_v16, 0.0  ;;  %v6958_v42 = vpop.f32.mrb[16].mxu0 }
0x18e3   :  { %v7343_v17 = vadd.f32 %v6958_v42, %v5847_v49  ;;  %v5735_v25 = vpop.f32.mrb[17].mxu0  ;;  %v5785_v30 = vmul.f32 %v5848_v12, %v5770_v39 }
0x18e4   :  { %v7344_v56 = vadd.f32 %v5847_v49, %v5735_v25  ;;  %v5784_v58 = vmul.f32 %v5848_v12, %v5769_v38 }
0x18e5   :  { %v5772_v59 = vmax.f32 %v7343_v17, 0.0  ;;  %v5795_v28 = vsel %vm844_vm1, %v5785_v30, 0.0 }
0x18e6   :  { %v5771_v21 = vmax.f32 %v7344_v56, 0.0  ;;  %5796 = vadd.xlane.f32.xlu0 %v5795_v28  ;;  %v6961_v35 = vpop.f32.mrb[18].mxu0  ;;  %v5792_v54 = vsel %vm844_vm1, %v5784_v58, 0.0 }
0x18e7   :  { %v7345_v62 = vadd.f32 %v6961_v35, %v5847_v49  ;;  %v5747_v15 = vpop.f32.mrb[19].mxu0  ;;  %5793 = vadd.xlane.f32.xlu1 %v5792_v54  ;;  %v5787_v20 = vmul.f32 %v5848_v12, %v5772_v59 }
0x18e8   :  { %v7346_v19 = vadd.f32 %v5847_v49, %v5747_v15  ;;  %v5786_v47 = vmul.f32 %v5848_v12, %v5771_v21 }
0x18e9   :  { %v5774_v27 = vmax.f32 %v7345_v62, 0.0  ;;  %v5801_v48 = vsel %vm844_vm1, %v5787_v20, 0.0 }
0x18ea   :  { %v5773_v40 = vmax.f32 %v7346_v19, 0.0  ;;  %v6964_v36 = vpop.f32.mrb[20].mxu0  ;;  %v5798_v8 = vsel %vm844_vm1, %v5786_v47, 0.0 }
0x18eb   :  { %v7347_v9 = vadd.f32 %v6964_v36, %v5847_v49  ;;  %v5759_v3 = vpop.f32.mrb[21].mxu0  ;;  %5799 = vadd.xlane.f32.xlu0 %v5798_v8  ;;  %5802 = vadd.xlane.f32.xlu1 %v5801_v48  ;;  %v5789_v63 = vmul.f32 %v5848_v12, %v5774_v27 }
0x18ec   :  { %v7348_v22 = vadd.f32 %v5847_v49, %v5759_v3  ;;  %v5788_v0 = vmul.f32 %v5848_v12, %v5773_v40 }
0x18ed   :  { %v5776_v2 = vmax.f32 %v7347_v9, 0.0  ;;  %v5807_v4 = vsel %vm844_vm1, %v5789_v63, 0.0 }
0x18ee   :  { %v5775_v52 = vmax.f32 %v7348_v22, 0.0  ;;  %v5804_v57 = vsel %vm844_vm1, %v5788_v0, 0.0 }
0x18ef   :  { %5805 = vadd.xlane.f32.xlu0 %v5804_v57  ;;  %5808 = vadd.xlane.f32.xlu1 %v5807_v4  ;;  %v5791_v1 = vmul.f32 %v5848_v12, %v5776_v2 }
0x18f0   :  { %v5790_v18 = vmul.f32 %v5848_v12, %v5775_v52 }
0x18f1   :  { %v5813_v53 = vsel %vm844_vm1, %v5791_v1, 0.0 }
0x18f2   :  { %v5810_v5 = vsel %vm844_vm1, %v5790_v18, 0.0 }
0x18f3   :  { %5811 = vadd.xlane.f32.xlu0 %v5810_v5  ;;  %5814 = vadd.xlane.f32.xlu1 %v5813_v53 }
0x1973   :  { %v5797_v29 = vpop.xlane.xlu0 %5796 }
0x1974   :  { %v5819_v34 = vadd.f32 %v5817_v26, %v5797_v29  ;;  %v5794_v13 = vpop.xlane.xlu1 %5793 }
0x1975   :  { %v5818_v32 = vadd.f32 %v5817_v26, %v5794_v13 }
0x1976   :  { %5827 = vst [vmem:[%s8468_s10 + $0x8] sm:$0xff] %v5819_v34 }
0x1977   :  { %5826 = vst [vmem:[%s8468_s10] sm:$0xff] %v5818_v32 }
0x1978   :  { %v5800_v61 = vpop.xlane.xlu0 %5799  ;;  %v5803_v6 = vpop.xlane.xlu1 %5802 }
0x1979   :  { %v5820_v24 = vadd.f32 %v5817_v26, %v5800_v61  ;;  %v5821_v7 = vadd.f32 %v5817_v26, %v5803_v6 }
0x197b   :  { %5828 = vst [vmem:[%s8468_s10 + $0x10] sm:$0xff] %v5820_v24  ;;  %5829 = vst [vmem:[%s8468_s10 + $0x18] sm:$0xff] %v5821_v7 }
0x197c   :  { %v5806_v10 = vpop.xlane.xlu0 %5805  ;;  %v5809_v31 = vpop.xlane.xlu1 %5808 }
0x197d   :  { %v5822_v11 = vadd.f32 %v5817_v26, %v5806_v10  ;;  %v5823_v37 = vadd.f32 %v5817_v26, %v5809_v31 }
0x197f   :  { %5830 = vst [vmem:[%s8468_s10 + $0x20] sm:$0xff] %v5822_v11  ;;  %5831 = vst [vmem:[%s8468_s10 + $0x28] sm:$0xff] %v5823_v37 }
0x1980   :  { %v5812_v55 = vpop.xlane.xlu0 %5811  ;;  %v5815_v33 = vpop.xlane.xlu1 %5814 }
0x1981   :  { %v5824_v51 = vadd.f32 %v5817_v26, %v5812_v55  ;;  %v5825_v60 = vadd.f32 %v5817_v26, %v5815_v33 }
0x1983   :  { %5832 = vst [vmem:[%s8468_s10 + $0x30] sm:$0xff] %v5824_v51  ;;  %5833 = vst [vmem:[%s8468_s10 + $0x38] sm:$0xff] %v5825_v60 }

</bundles_post_ra>
